<compile_context>
chip_gen: v7x
topology: tpu7x:2x2x1
jax: 0.10.0
libtpu: 0.0.40
codegen_flags: <defaults>
</compile_context>

<pallas_src>
import functools
import math

import numpy as np

import jax
import jax.numpy as jnp
from jax.experimental import pallas as pl
from jax.experimental.pallas import tpu as pltpu

LANE = 128


# ------------------------------ helpers -------------------------------------

def _round_up(x, m):
    return (x + m - 1) // m * m


def _pad2d(a, rows, cols):
    r, c = a.shape
    return jnp.pad(a, ((0, rows - r), (0, cols - c)))


def _maxk_rows(x, hid, k):
    """Keep the k largest entries of each row of x (f32), zero the rest.

    `hid` is the static count of valid feature lanes; padded lanes never count
    toward the top-k and are forced to zero in the output.  Ties at the k-th
    boundary are all kept (measure-zero for f32 matmul outputs).  Only called
    in kernel epilogues (once per output row-tile), so the k-round serial
    cross-lane max is off the streamed reduction path.
    """
    rows, cols = x.shape
    neg_inf = jnp.float32(-jnp.inf)
    if hid < cols:
        lane = jax.lax.broadcasted_iota(jnp.int32, (rows, cols), 1)
        valid = lane < hid
        work = jnp.where(valid, x, neg_inf)
    else:
        valid = None
        work = x
    thresh = jnp.max(work, axis=1, keepdims=True)
    for _ in range(k - 1):
        work = jnp.where(work >= thresh, neg_inf, work)
        thresh = jnp.max(work, axis=1, keepdims=True)
    keep = x >= thresh
    if valid is not None:
        keep = jnp.logical_and(valid, keep)
    return jnp.where(keep, x, jnp.float32(0.0))


def build_block_schedule(A_np, tm, tk):
    """Per dst row-tile: compacted list of non-empty source-tile columns.

    Returns (cols_flat[int32, nib*max_cnt], counts[int32, nib], max_cnt).
    Tail entries repeat the last valid column so consecutive padded grid steps
    map to the same block (no extra DMA) and are skipped by pl.when.
    """
    N = A_np.shape[0]
    nib, njb = N // tm, N // tk
    nz = A_np.reshape(nib, tm, njb, tk).any(axis=(1, 3))       # (nib, njb) bool
    counts = nz.sum(axis=1).astype(np.int32)                   # (nib,)
    max_cnt = max(int(counts.max()), 1)
    cols = np.zeros((nib, max_cnt), dtype=np.int32)
    for i in range(nib):
        idx = np.nonzero(nz[i])[0].astype(np.int32)
        cols[i, : len(idx)] = idx
        if len(idx) > 0:
            cols[i, len(idx):] = idx[-1]
    return jnp.asarray(cols.reshape(-1)), jnp.asarray(counts), max_cnt


# ----------------------------- Pallas kernels ------------------------------

def linear_kernel(x_ref, w_ref, b_ref, o_ref, *, k, hid, apply_maxk):
    # y = x @ W_t + b.  x and W_t are bf16 (pre-cast in the wrapper), single
    # MXU matmul with f32 accumulation.  Optional fused MaxK epilogue so the
    # next conv layer reads already-MaxK'd bf16 activations.
    h = (jnp.dot(x_ref[...], w_ref[...], preferred_element_type=jnp.float32)
         + b_ref[...])
    if apply_maxk:
        h = _maxk_rows(h, hid, k)
    o_ref[...] = h.astype(o_ref.dtype)


def maxk_sage_conv_kernel(cols_ref, cnts_ref, x_src_ref, x_dst_ref, adj_ref,
                          inv_deg_ref, w_self_ref, b_self_ref, w_neigh_ref,
                          o_ref, acc_ref, *, k, hid, apply_maxk_out):
    # Fused DGL SAGEConv('mean') with in==out feats (lin_before_mp is False):
    #   rst = fc_self(x) + fc_neigh((A @ x) * inv_deg)
    # x is already MaxK'd by the producing kernel.  The inner (reduction) loop
    # is pure DMA + MXU; the finalize applies the row scale, the two weight
    # matmuls, the bias, and (for non-last layers) MaxK for the next layer.
    i = pl.program_id(0)
    j = pl.program_id(1)

    @pl.when(j == 0)
    def _():
        acc_ref[...] = jnp.zeros_like(acc_ref)

    # Skip padded tail steps of the block-sparse schedule (and empty row-tiles).
    @pl.when(j < cnts_ref[i])
    def _():
        acc_ref[...] += jnp.dot(adj_ref[...], x_src_ref[...],
                                preferred_element_type=jnp.float32)

    @pl.when(j == pl.num_programs(1) - 1)
    def _():
        neigh = acc_ref[...] * inv_deg_ref[...]          # f32 (tm,H) * (tm,1)
        h_self = (jnp.dot(x_dst_ref[...], w_self_ref[...],
                          preferred_element_type=jnp.float32) + b_self_ref[...])
        h_neigh = jnp.dot(neigh.astype(jnp.bfloat16), w_neigh_ref[...],
                          preferred_element_type=jnp.float32)
        h = h_self + h_neigh
        if apply_maxk_out:
            h = _maxk_rows(h, hid, k)
        o_ref[...] = h.astype(o_ref.dtype)


# ------------------------------ Wrappers ------------------------------------

def linear(x, w_t, b, *, out_dtype, tm=512, apply_maxk=False, k=0, hid=0):
    N, din = x.shape
    dout = w_t.shape[1]
    tm = min(tm, N)
    assert N % tm == 0
    return pl.pallas_call(
        functools.partial(linear_kernel, k=k, hid=hid, apply_maxk=apply_maxk),
        out_shape=jax.ShapeDtypeStruct((N, dout), out_dtype),
        grid=(N // tm,),
        in_specs=[
            pl.BlockSpec((tm, din), lambda i: (i, 0)),
            pl.BlockSpec((din, dout), lambda i: (0, 0)),
            pl.BlockSpec((1, dout), lambda i: (0, 0)),
        ],
        out_specs=pl.BlockSpec((tm, dout), lambda i: (i, 0)),
        compiler_params=pltpu.CompilerParams(dimension_semantics=("parallel",)),
    )(x, w_t, b)


def maxk_sage_conv(x_bf16, adj01_bf16, inv_deg, cols_flat, counts, max_cnt,
                   w_self_t, b_self, w_neigh_t, *, k, hid, apply_maxk_out,
                   tm=512, tk=512):
    # Grid: dst-node row tiles (parallel, split across TCs on v7x) x compacted
    # non-empty source-tile columns (reduction, last, arbitrary).
    N, H = x_bf16.shape
    tm = min(tm, N)
    tk = min(tk, N)
    assert N % tm == 0 and N % tk == 0
    nib = N // tm

    def src_map(i, j, cols, cnts):
        return (cols[i * max_cnt + j], 0)

    def dst_map(i, j, cols, cnts):
        return (i, 0)

    def adj_map(i, j, cols, cnts):
        return (i, cols[i * max_cnt + j])

    def fixed_map(i, j, cols, cnts):
        return (0, 0)

    grid_spec = pltpu.PrefetchScalarGridSpec(
        num_scalar_prefetch=2,                 # cols_flat, counts (SMEM)
        grid=(nib, max_cnt),
        in_specs=[
            pl.BlockSpec((tk, H), src_map),    # source features (bf16, streamed)
            pl.BlockSpec((tm, H), dst_map),    # dst features (resident over j)
            pl.BlockSpec((tm, tk), adj_map),   # 0/1 connectivity tile (bf16)
            pl.BlockSpec((tm, 1), dst_map),    # 1/in_deg row scale (f32)
            pl.BlockSpec((H, H), fixed_map),   # W_self^T (bf16)
            pl.BlockSpec((1, H), fixed_map),   # b_self (f32)
            pl.BlockSpec((H, H), fixed_map),   # W_neigh^T (bf16)
        ],
        out_specs=pl.BlockSpec((tm, H), dst_map),
        scratch_shapes=[pltpu.VMEM((tm, H), jnp.float32)],
    )
    return pl.pallas_call(
        functools.partial(maxk_sage_conv_kernel, k=k, hid=hid,
                          apply_maxk_out=apply_maxk_out),
        out_shape=jax.ShapeDtypeStruct((N, H), jnp.bfloat16),
        grid_spec=grid_spec,
        compiler_params=pltpu.CompilerParams(
            dimension_semantics=("parallel", "arbitrary")),
    )(cols_flat, counts, x_bf16, x_bf16, adj01_bf16, inv_deg,
      w_self_t, b_self, w_neigh_t)


def sage_forward(x, A, params, *, num_layers, maxk, tm=512, tk=512):
    """A is the dense 0/1 directed connectivity: A[v, u] = 1 iff edge u -> v."""
    N, in_size = x.shape
    hid = params["W_in"].shape[0]
    out_size = params["W_out"].shape[0]
    assert maxk <= hid
    in_p = _round_up(in_size, LANE)
    hid_p = _round_up(hid, LANE)
    out_p = _round_up(out_size, LANE)
    tm = min(tm, N)
    tk = min(tk, N)

    # -------- one-time layout / schedule prep (outside the kernels) ----------
    x_p = _pad2d(x, N, in_p).astype(jnp.bfloat16)
    A_np = np.asarray(jax.device_get(A))
    cols_flat, counts, max_cnt = build_block_schedule(A_np, tm, tk)
    adj01 = jnp.asarray(A_np, dtype=jnp.bfloat16)            # 0/1 exact in bf16
    deg = jnp.sum(A, axis=1, keepdims=True)
    inv_deg = jnp.where(deg > 0, 1.0 / jnp.maximum(deg, 1.0), 0.0).astype(jnp.float32)

    w_in_t = _pad2d(params["W_in"].T, in_p, hid_p).astype(jnp.bfloat16)
    b_in = _pad2d(params["b_in"], 1, hid_p)
    w_out_t = _pad2d(params["W_out"].T, hid_p, out_p).astype(jnp.bfloat16)
    b_out = _pad2d(params["b_out"], 1, out_p)
    w_self_t = [_pad2d(params["W_self"][i].T, hid_p, hid_p).astype(jnp.bfloat16)
                for i in range(num_layers)]
    b_self = [_pad2d(params["b_self"][i], 1, hid_p) for i in range(num_layers)]
    w_neigh_t = [_pad2d(params["W_neigh"][i].T, hid_p, hid_p).astype(jnp.bfloat16)
                 for i in range(num_layers)]

    # -------- kernels ---------------------------------------------------------
    h = linear(x_p, w_in_t, b_in, out_dtype=jnp.bfloat16, tm=tm,
               apply_maxk=(num_layers >= 1), k=maxk, hid=hid)
    for i in range(num_layers):
        h = maxk_sage_conv(h, adj01, inv_deg, cols_flat, counts, max_cnt,
                           w_self_t[i], b_self[i], w_neigh_t[i],
                           k=maxk, hid=hid,
                           apply_maxk_out=(i < num_layers - 1),
                           tm=tm, tk=tk)
    out = linear(h, w_out_t, b_out, out_dtype=jnp.float32, tm=tm, apply_maxk=False)
    return out[:, :out_size]


# ----------------------------- Reference (plain JAX) ------------------------

def ref_forward(x, A, params, *, num_layers, maxk):
    # Mirrors the kernels' numerics: bf16 MXU operands, f32 accumulation,
    # bf16 inter-layer activations, 0/1 adjacency with f32 1/deg row scale.
    def bdot(a, b):
        return jnp.dot(a.astype(jnp.bfloat16), b.astype(jnp.bfloat16),
                       preferred_element_type=jnp.float32)

    def maxk_f(h):
        work = h
        thresh = jnp.max(work, axis=1, keepdims=True)
        for _ in range(maxk - 1):
            work = jnp.where(work >= thresh, -jnp.inf, work)
            thresh = jnp.max(work, axis=1, keepdims=True)
        return jnp.where(h >= thresh, h, 0.0)

    deg = jnp.sum(A, axis=1, keepdims=True)
    inv_deg = jnp.where(deg > 0, 1.0 / jnp.maximum(deg, 1.0), 0.0)

    h = bdot(x, params["W_in"].T) + params["b_in"]
    if num_layers >= 1:
        h = maxk_f(h)
    h = h.astype(jnp.bfloat16)
    for i in range(num_layers):
        neigh = bdot(A, h) * inv_deg
        h_new = (bdot(h, params["W_self"][i].T) + params["b_self"][i]
                 + bdot(neigh, params["W_neigh"][i].T))
        if i < num_layers - 1:
            h_new = maxk_f(h_new)
        h = h_new.astype(jnp.bfloat16)
    return bdot(h, params["W_out"].T) + params["b_out"]


# --------------------------------- Main --------------------------------------

def xavier_uniform(key, shape):
    fan_out, fan_in = shape
    bound = math.sqrt(6.0 / (fan_in + fan_out))
    return jax.random.uniform(key, shape, jnp.float32, -bound, bound)


if __name__ == "__main__":
    N = 256          # number of graph nodes (2x2 block grid at tm=tk=128)
    in_size = 32
    hid_size = 64
    out_size = 16
    num_layers = 2   # num_hid_layers
    maxk = 8
    tm = tk = 128    # small-demo tiles; production default is 512

    key = jax.random.PRNGKey(0)
    ks = jax.random.split(key, 16)

    # Node features.
    x = jax.random.normal(ks[0], (N, in_size), jnp.float32)

    # Random sparse directed graph -> dense 0/1 connectivity (no self-loops).
    A = (jax.random.uniform(ks[1], (N, N)) < 0.05).astype(jnp.float32)
    A = A * (1.0 - jnp.eye(N, dtype=jnp.float32))
    # Carve out one all-zero (128, 128) block so the block-sparse schedule's
    # tail/skip path (pl.when(j < counts[i]) + padded cols) is exercised.
    blk_mask = jnp.ones((N, N), jnp.float32).at[:128, 128:].set(0.0)
    A = A * blk_mask

    # Deterministic parameter init (matches __init__ shapes; xavier for lin_in/lin_out).
    params = {
        "W_in": xavier_uniform(ks[2], (hid_size, in_size)),
        "b_in": jnp.zeros((1, hid_size), jnp.float32),
        "W_out": xavier_uniform(ks[3], (out_size, hid_size)),
        "b_out": jnp.zeros((1, out_size), jnp.float32),
        "W_self": [xavier_uniform(ks[4 + 2 * i], (hid_size, hid_size))
                   for i in range(num_layers)],
        "b_self": [jnp.zeros((1, hid_size), jnp.float32) for _ in range(num_layers)],
        "W_neigh": [xavier_uniform(ks[5 + 2 * i], (hid_size, hid_size))
                    for i in range(num_layers)],
    }

    out = sage_forward(x, A, params, num_layers=num_layers, maxk=maxk, tm=tm, tk=tk)
    out = jax.block_until_ready(out)
    assert out.shape == (N, out_size)

    ref = ref_forward(x, A, params, num_layers=num_layers, maxk=maxk)
    assert jnp.allclose(out, ref, rtol=1e-2, atol=1e-2), "mismatch vs JAX reference"

    print("KERNEL_OK")
</pallas_src>

<mosaic_0001>
module attributes {stable_mosaic.version = 11 : i64} {
  func.func @linear_kernel(%arg0: i32, %arg1: memref<128x128xbf16, #tpu.memory_space<vmem>>, %arg2: memref<128x128xbf16, #tpu.memory_space<vmem>>, %arg3: memref<1x128xf32, #tpu.memory_space<vmem>>, %arg4: memref<128x128xbf16, #tpu.memory_space<vmem>>) attributes {dimension_semantics = [#tpu.dimension_semantics<parallel>], iteration_bounds = array<i64: 2>, scalar_prefetch = 0 : i64, scratch_operands = 0 : i64, tpu.core_type = #tpu.core_type<tc>, window_params = [{transform_indices = @transform_0, window_bounds = array<i64: 128, 128>}, {pipeline_mode = #tpu.pipeline_mode<synchronous>, transform_indices = @transform_1, window_bounds = array<i64: 128, 128>}, {pipeline_mode = #tpu.pipeline_mode<synchronous>, transform_indices = @transform_2, window_bounds = array<i64: 1, 128>}, {transform_indices = @transform_3, window_bounds = array<i64: 128, 128>}]} {
    %c0 = arith.constant 0 : index
    %c0_0 = arith.constant 0 : index
    %0 = vector.load %arg1[%c0, %c0_0] : memref<128x128xbf16, #tpu.memory_space<vmem>>, vector<128x128xbf16>
    %c0_1 = arith.constant 0 : index
    %c0_2 = arith.constant 0 : index
    %1 = vector.load %arg2[%c0_1, %c0_2] : memref<128x128xbf16, #tpu.memory_space<vmem>>, vector<128x128xbf16>
    %cst = arith.constant dense<0.000000e+00> : vector<128x128xf32>
    %2 = tpu.matmul %0, %1, %cst {dimension_numbers = #tpu.dot_dimension_numbers<[1], [0], [0], [1], [0, 0, 1, 1], [], []>} : vector<128x128xbf16>, vector<128x128xbf16>, vector<128x128xf32> -> vector<128x128xf32>
    %c0_3 = arith.constant 0 : index
    %c0_4 = arith.constant 0 : index
    %3 = vector.load %arg3[%c0_3, %c0_4] : memref<1x128xf32, #tpu.memory_space<vmem>>, vector<1x128xf32>
    %4 = vector.broadcast %3 : vector<1x128xf32> to vector<128x128xf32>
    %5 = arith.addf %2, %4 : vector<128x128xf32>
    %6 = tpu.iota {dimensions = array<i32: 1>} : vector<128x128xi32>
    %c64_i32 = arith.constant 64 : i32
    %7 = vector.broadcast %c64_i32 : i32 to vector<128x128xi32>
    %8 = arith.cmpi slt, %6, %7 : vector<128x128xi32>
    %cst_5 = arith.constant 0xFF800000 : f32
    %9 = vector.broadcast %cst_5 : f32 to vector<128x128xf32>
    %10 = arith.select %8, %5, %9 : vector<128x128xi1>, vector<128x128xf32>
    %cst_6 = arith.constant dense<0xFF800000> : vector<128xf32>
    %11 = vector.multi_reduction <maximumf>, %10, %cst_6 [1] : vector<128x128xf32> to vector<128xf32>
    %12 = vector.shape_cast %11 : vector<128xf32> to vector<128x1xf32>
    %13 = vector.broadcast %12 : vector<128x1xf32> to vector<128x128xf32>
    %14 = arith.cmpf oge, %10, %13 : vector<128x128xf32>
    %cst_7 = arith.constant 0xFF800000 : f32
    %15 = vector.broadcast %cst_7 : f32 to vector<128x128xf32>
    %16 = arith.select %14, %15, %10 : vector<128x128xi1>, vector<128x128xf32>
    %cst_8 = arith.constant dense<0xFF800000> : vector<128xf32>
    %17 = vector.multi_reduction <maximumf>, %16, %cst_8 [1] : vector<128x128xf32> to vector<128xf32>
    %18 = vector.shape_cast %17 : vector<128xf32> to vector<128x1xf32>
    %19 = vector.broadcast %18 : vector<128x1xf32> to vector<128x128xf32>
    %20 = arith.cmpf oge, %16, %19 : vector<128x128xf32>
    %cst_9 = arith.constant 0xFF800000 : f32
    %21 = vector.broadcast %cst_9 : f32 to vector<128x128xf32>
    %22 = arith.select %20, %21, %16 : vector<128x128xi1>, vector<128x128xf32>
    %cst_10 = arith.constant dense<0xFF800000> : vector<128xf32>
    %23 = vector.multi_reduction <maximumf>, %22, %cst_10 [1] : vector<128x128xf32> to vector<128xf32>
    %24 = vector.shape_cast %23 : vector<128xf32> to vector<128x1xf32>
    %25 = vector.broadcast %24 : vector<128x1xf32> to vector<128x128xf32>
    %26 = arith.cmpf oge, %22, %25 : vector<128x128xf32>
    %cst_11 = arith.constant 0xFF800000 : f32
    %27 = vector.broadcast %cst_11 : f32 to vector<128x128xf32>
    %28 = arith.select %26, %27, %22 : vector<128x128xi1>, vector<128x128xf32>
    %cst_12 = arith.constant dense<0xFF800000> : vector<128xf32>
    %29 = vector.multi_reduction <maximumf>, %28, %cst_12 [1] : vector<128x128xf32> to vector<128xf32>
    %30 = vector.shape_cast %29 : vector<128xf32> to vector<128x1xf32>
    %31 = vector.broadcast %30 : vector<128x1xf32> to vector<128x128xf32>
    %32 = arith.cmpf oge, %28, %31 : vector<128x128xf32>
    %cst_13 = arith.constant 0xFF800000 : f32
    %33 = vector.broadcast %cst_13 : f32 to vector<128x128xf32>
    %34 = arith.select %32, %33, %28 : vector<128x128xi1>, vector<128x128xf32>
    %cst_14 = arith.constant dense<0xFF800000> : vector<128xf32>
    %35 = vector.multi_reduction <maximumf>, %34, %cst_14 [1] : vector<128x128xf32> to vector<128xf32>
    %36 = vector.shape_cast %35 : vector<128xf32> to vector<128x1xf32>
    %37 = vector.broadcast %36 : vector<128x1xf32> to vector<128x128xf32>
    %38 = arith.cmpf oge, %34, %37 : vector<128x128xf32>
    %cst_15 = arith.constant 0xFF800000 : f32
    %39 = vector.broadcast %cst_15 : f32 to vector<128x128xf32>
    %40 = arith.select %38, %39, %34 : vector<128x128xi1>, vector<128x128xf32>
    %cst_16 = arith.constant dense<0xFF800000> : vector<128xf32>
    %41 = vector.multi_reduction <maximumf>, %40, %cst_16 [1] : vector<128x128xf32> to vector<128xf32>
    %42 = vector.shape_cast %41 : vector<128xf32> to vector<128x1xf32>
    %43 = vector.broadcast %42 : vector<128x1xf32> to vector<128x128xf32>
    %44 = arith.cmpf oge, %40, %43 : vector<128x128xf32>
    %cst_17 = arith.constant 0xFF800000 : f32
    %45 = vector.broadcast %cst_17 : f32 to vector<128x128xf32>
    %46 = arith.select %44, %45, %40 : vector<128x128xi1>, vector<128x128xf32>
    %cst_18 = arith.constant dense<0xFF800000> : vector<128xf32>
    %47 = vector.multi_reduction <maximumf>, %46, %cst_18 [1] : vector<128x128xf32> to vector<128xf32>
    %48 = vector.shape_cast %47 : vector<128xf32> to vector<128x1xf32>
    %49 = vector.broadcast %48 : vector<128x1xf32> to vector<128x128xf32>
    %50 = arith.cmpf oge, %46, %49 : vector<128x128xf32>
    %cst_19 = arith.constant 0xFF800000 : f32
    %51 = vector.broadcast %cst_19 : f32 to vector<128x128xf32>
    %52 = arith.select %50, %51, %46 : vector<128x128xi1>, vector<128x128xf32>
    %cst_20 = arith.constant dense<0xFF800000> : vector<128xf32>
    %53 = vector.multi_reduction <maximumf>, %52, %cst_20 [1] : vector<128x128xf32> to vector<128xf32>
    %54 = vector.shape_cast %53 : vector<128xf32> to vector<128x1xf32>
    %55 = vector.broadcast %54 : vector<128x1xf32> to vector<128x128xf32>
    %56 = arith.cmpf oge, %5, %55 : vector<128x128xf32>
    %57 = arith.andi %8, %56 : vector<128x128xi1>
    %cst_21 = arith.constant 0.000000e+00 : f32
    %58 = vector.broadcast %cst_21 : f32 to vector<128x128xf32>
    %59 = arith.select %57, %5, %58 : vector<128x128xi1>, vector<128x128xf32>
    %60 = arith.truncf %59 : vector<128x128xf32> to vector<128x128xbf16>
    %c0_22 = arith.constant 0 : index
    %c0_23 = arith.constant 0 : index
    %61 = vector.load %arg4[%c0_22, %c0_23] : memref<128x128xbf16, #tpu.memory_space<vmem>>, vector<128x128xbf16>
    tpu.vector_store %arg4[%c0_22, %c0_23], %60 {strides = array<i32>} : memref<128x128xbf16, #tpu.memory_space<vmem>>, vector<128x128xbf16>,
    return
  }
  func.func @transform_0(%arg0: i32) -> (i32, i32) {
    %c0_i32 = arith.constant 0 : i32
    %c0_i32_0 = arith.constant 0 : i32
    return %arg0, %c0_i32 : i32, i32
  }
  func.func @transform_1(%arg0: i32) -> (i32, i32) {
    %c0_i32 = arith.constant 0 : i32
    %c0_i32_0 = arith.constant 0 : i32
    %c0_i32_1 = arith.constant 0 : i32
    return %c0_i32, %c0_i32_0 : i32, i32
  }
  func.func @transform_2(%arg0: i32) -> (i32, i32) {
    %c0_i32 = arith.constant 0 : i32
    %c0_i32_0 = arith.constant 0 : i32
    %c0_i32_1 = arith.constant 0 : i32
    return %c0_i32, %c0_i32_0 : i32, i32
  }
  func.func @transform_3(%arg0: i32) -> (i32, i32) {
    %c0_i32 = arith.constant 0 : i32
    %c0_i32_0 = arith.constant 0 : i32
    return %arg0, %c0_i32 : i32, i32
  }
}

</mosaic_0001>

<bundles_post_ra>
// kernel: tpu_custom_call.1
= control target key start
LH: loop header
LB: loop body
LE: loop exit
PB: predicated region body
PF: predicated region fallthrough
CT: control target
= control target key end

     0   :  { %8 = vsyncpa [#allocation3], 0  ;;  %s2452_s0 = inlined_call_operand.hbm [shape: bf16[256,128], index: 0, kind: input, shape index: {}]   ;;  %s2453_s1 = inlined_call_operand.hbm [shape: bf16[128,128], index: 1, kind: input, shape index: {}]   ;;  %s2454_s2 = inlined_call_operand.vmem [shape: f32[1,128], index: 2, kind: input, shape index: {}]   ;;  %s2455_s3 = inlined_call_operand.hbm [shape: bf16[256,128], index: 3, kind: output, shape index: {}]  }
   0x1   :  { %10 = vsyncpa [#allocation3 + $0x1], 0 }
   0x2   :  { %11 = vsyncpa [#allocation6], 0 }
   0x3   :  { %12 = vsyncpa [#allocation4], 0 }
   0x4   :  { %14 = vsyncpa [#allocation4 + $0x1], 0  ;;  %s1575_s12 = smov 0   ;;  %s1577_s13 = smov 0  }
   0x5   :  { %s1579_s14 = smov 0   ;;  %s1581_s15 = smov 0  }
   0x6 LB: > { %s1596_s16 = sadd.s32 4294967295, %s1546_s15   ;;  %s1163_s17 = sadd.s32 4294967294, %s1546_s15   ;;  %s1546_s15 = sphi %s1581_s15, %s2475_s15   ;;  %s1542_s14 = sphi %s1579_s14, %s2474_s14   ;;  %s1538_s13 = sphi %s1577_s13, %s2473_s13   ;;  %s1534_s12 = sphi %s1575_s12, %s2472_s12  }
   0x7   : > { %p40_p0 = scmp.ne.s32.totalorder %s1538_s13, %s1534_s12  ;;  %p2456_p1 = scmp.eq.s32.totalorder %s1596_s16, 0 }
   0x8   : > { %p112_p3 = scmp.eq.s32.totalorder %s1163_s17, 1  ;;  %p1164_p5 = scmp.ge.s32.totalorder %s1546_s15, 1 }
   0x9   : > { %p1605_p4 = por %p2456_p1, %p40_p0  ;;  %p119_p7 = scmp.lt.s32.totalorder %s1546_s15, 3 }
   0xa   : > { %p1610_p6 = por %p112_p3, %p40_p0  ;;  %s1548_s21 = smov [#allocation5]  }
   0xb   : > { %s2459_s18 = scalar_select %p1605_p4, 1, 0 }
   0xc   : > { %s2460_s19 = scalar_select %p1610_p6, 1, 0 }
   0xd   : > { %p1615_p8 = pnand %p1164_p5, %p119_p7  ;;  %s131_s22 = sshll.u32 %s1548_s21, 4  ;;  %s1619_s22 = int_to_ptr.vmem [resolvable:$true] %s131_s22 }
   0xe   : > { %s1631_s24 = sadd.s32 1, %s1546_s15   ;;  %s27_s25 = sadd.s32 1, %s1542_s14 }
   0xf   : > { %s2461_s20 = scalar_select %p1615_p8, 1, 0 }
  0x10   : > { %p1349_p9 = pneg %p1615_p8  ;;  %s24_s26 = ssub.s32 %s1546_s15, %s1631_s24 }
  0x11   : > { %s1418_s29 = scalar_lea.hbm %s2453_s1, 1024 }
  0x12   : > { %p1626_p11 = pnand %p1349_p9, %p2456_p1  ;;  %p1419_p12 = scmp.ne.s32.totalorder %s2453_s1, %s1418_s29 }
  0x13   : > { %p1425_p5 = scmp.lt.u32.totalorder %s1418_s29, %s2453_s1 }
  0x14   : > { %p1420_p13 = pneg %p1626_p11 }
  0x16   : > { %p1421_p0 = pnand %p1420_p13, %p1419_p12 }
  0x18   : > { %p1422_p3 = pneg %p1421_p0 }
  0x1a   : > { %p1427_p7 = pnand %p1425_p5, %p1422_p3 }
  0x1c   : > { %1430 = shalt.err (!%p1427_p7)
}
  0x1d   : > { %s1431_s7 = scalar_lea.vmem %s1619_s22, 1024  ;;  %p1439_p2 = scmp.lt.s32.totalorder %s1619_s22, %s1619_s22 }
  0x1e   : > { %p1432_p9 = scmp.ne.s32.totalorder %s1619_s22, %s1431_s7  ;;  %p1440_p6 = scmp.lt.s32.totalorder %s1431_s7, %s1431_s7 }
  0x20   : > { %p1434_p10 = pnand %p1432_p9, %p1420_p13  ;;  %p1441_p4 = por %p1440_p6, %p1439_p2 }
  0x22   : > { %p1435_p1 = pneg %p1434_p10 }
  0x24   : > { %p1442_p8 = pnand %p1441_p4, %p1435_p1 }
  0x26   : > { %1445 = shalt.err (!%p1442_p8)
}
  0x27   : > { %s1549_s8 = smov 64   ;;  %s1550_s9 = smov 4  }
  0x28   : > { %1352 = dma.hbm_to_vmem [thread:$0]  (!%p1626_p11), %s2453_s1, 1024, %s1619_s22, [#allocation6], %s1549_s8, %s1549_s8, %s1550_s9  }
  0x29   : > { %p25_p1 = scmp.eq.s32.totalorder %s24_s26, 0  ;;  %p34_p2 = scmp.ne.s32.totalorder %s1542_s14, %s1538_s13 }
  0x2a   : > { %p35_p4 = scmp.eq.s32.totalorder %s1546_s15, 0  ;;  %p1362_p6 = scmp.lt.s32.totalorder %s1546_s15, 2 }
  0x2b   : > { %s1665_s17 = scalar_select %p25_p1, %s1542_s14, %s27_s25  }
  0x2c   : > { %p36_p8 = por %p35_p4, %p34_p2  ;;  %p2463_p10 = scmp.eq.s32.totalorder %s1596_s16, 1 }
  0x2d   : > { %s148_s23 = sand.u32 1, %s1542_s14   ;;  %s1212_s27 = sshll.u32 %s1546_s15, 10 }
  0x2e   : > { %p1669_p12 = por %p2463_p10, %p34_p2  ;;  %s1167_s28 = sshll.u32 %s148_s23, 6 }
  0x2f   : > { %s1678_s4 = scalar_lea.hbm %s2452_s0, %s1212_s27  ;;  %s152_s22 = scalar_lea.vmem [#allocation2], %s1167_s28 }
  0x30   : > { %s159_s25 = sshll.u32 %s152_s22, 4  ;;  %p1680_p11 = pnand %p1362_p6, %p36_p8  ;;  %s1684_s25 = int_to_ptr.vmem [resolvable:$true] %s159_s25 }
  0x31   : > { %s1686_s5 = scalar_lea.sflag [#allocation3], %s148_s23  ;;  %s1446_s6 = scalar_lea.hbm %s1678_s4, 1024 }
  0x32   : > { %p1447_p13 = scmp.ne.s32.totalorder %s1678_s4, %s1446_s6  ;;  %p1448_p0 = pneg %p1680_p11 }
  0x33   : > { %s1451_s11 = scalar_lea.hbm %s2452_s0, 2048  ;;  %p1452_p7 = scmp.lt.u32.totalorder %s1678_s4, %s2452_s0 }
  0x34   : > { %p1449_p3 = pnand %p1448_p0, %p1447_p13  ;;  %p1453_p9 = scmp.lt.u32.totalorder %s1451_s11, %s1446_s6 }
  0x35   : > { %p1455_p2 = scmp.lt.u32.totalorder %s1446_s6, %s1678_s4 }
  0x36   : > { %p1450_p5 = pneg %p1449_p3  ;;  %p1454_p1 = por %p1453_p9, %p1452_p7 }
  0x38   : > { %p1456_p4 = por %p1455_p2, %p1454_p1 }
  0x3a   : > { %p1457_p6 = pnand %p1456_p4, %p1450_p5 }
  0x3c   : > { %1460 = shalt.err (!%p1457_p6)
}
  0x3d   : > { %s1461_s23 = scalar_lea.vmem %s1684_s25, 1024  ;;  %s1551_s29 = smov [#allocation2]  }
  0x3e   : > { %p1462_p8 = scmp.ne.s32.totalorder %s1684_s25, %s1461_s23  ;;  %s1466_s30 = sshll.u32 %s1551_s29, 4  ;;  %s1467_s30 = int_to_ptr.vmem [resolvable:$false] %s1466_s30 }
  0x3f   : > { %s1468_s22 = scalar_lea.vmem %s1467_s30, 2048  ;;  %p1469_p3 = scmp.lt.s32.totalorder %s1684_s25, %s1467_s30 }
  0x40   : > { %p1464_p10 = pnand %p1462_p8, %p1448_p0  ;;  %p1470_p7 = scmp.lt.s32.totalorder %s1468_s22, %s1461_s23 }
  0x42   : > { %p1465_p13 = pneg %p1464_p10  ;;  %p1471_p9 = por %p1470_p7, %p1469_p3 }
  0x44   : > { %p1472_p1 = pnand %p1471_p9, %p1465_p13 }
  0x46   : > { %1475 = shalt.err (!%p1472_p1)
}
  0x47   : > { %1356 = dma.hbm_to_vmem [thread:$0]  (!%p1680_p11), %s1678_s4, 1024, %s1684_s25, %s1686_s5, %s1549_s8, %s1549_s8, %s1550_s9  }
  0x48   : > { %p2466_p0 = scmp.ne.s32.totalorder %s2461_s20, 0 }
  0x49   : > { %s1720_s6 = sand.u32 (!%p2466_p0), 1, %s1538_s13   ;;  %p2467_p5 = scmp.ne.s32.totalorder (!%p2466_p0), %s2459_s18, 0 }
  0x4a   : > { %171 = sbr.rel (%p2466_p0) target bundleno = 1535 (0x5ff), region = 32  ;;  %s1171_s7 = sshll.u32 (!%p2466_p0), %s1720_s6, 6 }
  0x4b   : > { %s174_s10 = scalar_lea.sflag (!%p2466_p0), [#allocation3], %s1720_s6  ;;  %s1726_s26 = scalar_lea.vmem (!%p2466_p0), [#allocation2], %s1171_s7 }
  0x51   : > { %1521 = dma.done.wait (%p2467_p5), %s174_s10, 1024  }
  0x52   : > { %1523 = vsyncadd (%p2467_p5), %s174_s10, 4294966272  ;;  %p2468_p11 = scmp.eq.s32.totalorder %s1596_s16, 0 }
  0x54   : > { %1525 = dma.done.wait (%p2468_p11), [#allocation6], 1024   ;;  %p2469_p2 = pmov %p2468_p11 }
  0x55   : > { %v1402_v0 = vld [vmem:[#allocation5] sm:$0xff]   ;;  %v1403_v1 = vld [vmem:[#allocation5 + $0x8] sm:$0xff]   ;;  %v1404_v2 = vld [vmem:[#allocation5 + $0x10] sm:$0xff]   ;;  %v439_v16 = vlaneseq  ;;  %s2340_s8 = scalar_lea.vmem [#allocation7], %s1171_s7  ;;  %s1229_s4 = sshll.u32 %s1596_s16, 10 }
  0x56   : > { %1527 = vsyncadd (%p2469_p2), [#allocation6], 4294966272  ;;  %1293 = vmatprep.subr.bf16.mxu0 %v1402_v0  ;;  %1325 = vmatprep.subr.bf16.mxu1 %v1402_v0  ;;  %v1405_v3 = vld [vmem:[#allocation5 + $0x18] sm:$0xff]   ;;  %v1410_v4 = vld [vmem:[%s1726_s26] sm:$0xff]   ;;  %s1080_s9 = sshll.u32 %s2340_s8, 4  ;;  %s2405_s11 = scalar_lea.hbm %s2455_s3, %s1229_s4  ;;  %s2407_s9 = int_to_ptr.vmem [resolvable:$true] %s1080_s9 }
  0x57   : > { %1294 = vmatpush3.bf16.msra.mxu0 %v1402_v0  ;;  %1333 = vmatpush3.bf16.msra.mxu1 %v1402_v0  ;;  %v1411_v5 = vld [vmem:[%s1726_s26 + $0x20] sm:$0xff]   ;;  %v1407_v7 = vld [vmem:[#allocation5 + $0x28] sm:$0xff]   ;;  %v1408_v8 = vld [vmem:[#allocation5 + $0x30] sm:$0xff]   ;;  %v1744_v17 = vand.u32 127, %v439_v16  ;;  %s1067_s16 = scalar_lea.sflag [#allocation4], %s1720_s6  ;;  %s1476_s27 = scalar_lea.vmem %s2407_s9, 1024 }
  0x58   : > { %1295 = vmatprep.subr.bf16.mxu0 %v1403_v1  ;;  %1326 = vmatprep.subr.bf16.mxu1 %v1403_v1  ;;  %v1406_v6 = vld [vmem:[#allocation5 + $0x20] sm:$0xff]   ;;  %v1409_v9 = vld [vmem:[#allocation5 + $0x38] sm:$0xff]   ;;  %v1412_v10 = vld [vmem:[%s1726_s26 + $0x8] sm:$0xff]   ;;  %p1477_p4 = scmp.ne.s32.totalorder %s2407_s9, %s1476_s27  ;;  %s1552_s28 = smov [#allocation7]  }
  0x59   : > { %1309 = vmatprep.mubr.bf16.mxu0 %v1410_v4  ;;  %1317 = vmatprep.mubr.bf16.mxu1 %v1411_v5  ;;  %v1413_v11 = vld [vmem:[%s1726_s26 + $0x28] sm:$0xff]   ;;  %v1414_v12 = vld [vmem:[%s1726_s26 + $0x10] sm:$0xff]   ;;  %v1415_v14 = vld [vmem:[%s1726_s26 + $0x18] sm:$0xff]   ;;  %vm441_vm0 = vcmp.lt.s32.totalorder %v1744_v17, 64  ;;  %s1480_s23 = sshll.u32 %s1552_s28, 4  ;;  %s1481_s23 = int_to_ptr.vmem [resolvable:$false] %s1480_s23 }
  0x5a   : > { %v1416_v13 = vld [vmem:[%s1726_s26 + $0x30] sm:$0xff]   ;;  %v1417_v15 = vld [vmem:[%s1726_s26 + $0x38] sm:$0xff]   ;;  %v1174_v18 = vld [vmem:[%s2454_s2] ss:$0 sm:$0xff]  ;;  %p1478_p6 = pnand %p1477_p4, %p1669_p12  ;;  %s1482_s29 = scalar_lea.vmem %s1481_s23, 2048 }
  0x5b   : > { %1296 = vmatpush3.bf16.msra.mxu0 %v1403_v1  ;;  %1334 = vmatpush3.bf16.msra.mxu1 %v1403_v1  ;;  %p1483_p10 = scmp.lt.s32.totalorder %s2407_s9, %s1481_s23  ;;  %p1484_p13 = scmp.lt.s32.totalorder %s1482_s29, %s1476_s27 }
  0x5c   : > { %1297 = vmatprep.subr.bf16.mxu0 %v1404_v2  ;;  %1327 = vmatprep.subr.bf16.mxu1 %v1404_v2  ;;  %p1479_p8 = pneg %p1478_p6 }
  0x5d   : > { %p1485_p3 = por %p1484_p13, %p1483_p10 }
  0x5f   : > { %1298 = vmatpush3.bf16.msra.mxu0 %v1404_v2  ;;  %1335 = vmatpush3.bf16.msra.mxu1 %v1404_v2  ;;  %p1486_p7 = pnand %p1485_p3, %p1479_p8 }
  0x60   : > { %1299 = vmatprep.subr.bf16.mxu0 %v1405_v3  ;;  %1328 = vmatprep.subr.bf16.mxu1 %v1405_v3 }
  0x63   : > { %1300 = vmatpush3.bf16.msra.mxu0 %v1405_v3  ;;  %1336 = vmatpush3.bf16.msra.mxu1 %v1405_v3 }
  0x64   : > { %1301 = vmatprep.subr.bf16.mxu0 %v1406_v6  ;;  %1329 = vmatprep.subr.bf16.mxu1 %v1406_v6 }
  0x67   : > { %1302 = vmatpush3.bf16.msra.mxu0 %v1406_v6  ;;  %1337 = vmatpush3.bf16.msra.mxu1 %v1406_v6 }
  0x68   : > { %1303 = vmatprep.subr.bf16.mxu0 %v1407_v7  ;;  %1330 = vmatprep.subr.bf16.mxu1 %v1407_v7 }
  0x6b   : > { %1304 = vmatpush3.bf16.msra.mxu0 %v1407_v7  ;;  %1338 = vmatpush3.bf16.msra.mxu1 %v1407_v7 }
  0x6c   : > { %1305 = vmatprep.subr.bf16.mxu0 %v1408_v8  ;;  %1331 = vmatprep.subr.bf16.mxu1 %v1408_v8 }
  0x6f   : > { %1306 = vmatpush3.bf16.msra.mxu0 %v1408_v8  ;;  %1339 = vmatpush3.bf16.msra.mxu1 %v1408_v8 }
  0x70   : > { %1307 = vmatprep.subr.bf16.mxu0 %v1409_v9  ;;  %1332 = vmatprep.subr.bf16.mxu1 %v1409_v9 }
  0x73   : > { %1308 = vmatpush3.bf16.msra.mxu0 %v1409_v9  ;;  %1340 = vmatpush3.bf16.msra.mxu1 %v1409_v9 }
  0x76   : > { %1310 = vmatmul.mubr.bf16.vlgmr.msra.gmra.mrb[0].mxu0 %v1412_v10  ;;  %1318 = vmatmul.mubr.bf16.vlgmr.msra.gmra.mrb[0].mxu1 %v1413_v11 }
  0x77   : > { %1313 = vmatprep.mubr.bf16.mxu0 %v1414_v12  ;;  %1321 = vmatprep.mubr.bf16.mxu1 %v1416_v13 }
  0x7e   : > { %1314 = vmatmul.mubr.bf16.gmra.mrb[4].mxu0 %v1415_v14  ;;  %1322 = vmatmul.mubr.bf16.gmra.mrb[4].mxu1 %v1417_v15 }
 0x149   : > { %v1311_v19 = vpop.f32.mrb[0].mxu0  ;;  %v1319_v20 = vpop.f32.mrb[0].mxu1 }
 0x14a   : > { %v1750_v21 = vadd.f32 %v1311_v19, %v1174_v18  ;;  %v1752_v22 = vadd.f32 %v1319_v20, %v1174_v18  ;;  %v376_v23 = vpop.f32.mrb[1].mxu0  ;;  %v408_v24 = vpop.f32.mrb[1].mxu1 }
 0x14b   : > { %v1312_v25 = vpop.f32.mrb[2].mxu0  ;;  %v1320_v26 = vpop.f32.mrb[2].mxu1  ;;  %v1754_v27 = vadd.f32 %v1174_v18, %v376_v23  ;;  %v1764_v33 = vadd.f32 %v1174_v18, %v408_v24 }
 0x14c   : > { %v1756_v28 = vadd.f32 %v1312_v25, %v1174_v18  ;;  %v379_v29 = vpop.f32.mrb[3].mxu0  ;;  %v411_v30 = vpop.f32.mrb[3].mxu1  ;;  %v452_v31 = vsel %vm441_vm0, %v1752_v22, -inf  ;;  %v444_v32 = vsel %vm441_vm0, %v1750_v21, -inf  ;;  %v1766_v34 = vadd.f32 %v1320_v26, %v1174_v18 }
 0x14d   : > { %478 = vmax.xlane.f32.xlu0 %v452_v31  ;;  %462 = vmax.xlane.f32.xlu1 %v444_v32  ;;  %v1774_v36 = vsel %vm441_vm0, %v1754_v27, -inf  ;;  %v1777_v43 = vadd.f32 %v1174_v18, %v379_v29  ;;  %v1779_v44 = vadd.f32 %v1174_v18, %v411_v30  ;;  %v450_v46 = vsel %vm441_vm0, %v1764_v33, -inf }
 0x14e   : > { %v445_v35 = vsel %vm441_vm0, %v1756_v28, -inf  ;;  %v453_v45 = vsel %vm441_vm0, %v1766_v34, -inf }
 0x14f   : > { %v451_v51 = vsel %vm441_vm0, %v1779_v44, -inf  ;;  %v443_v52 = vsel %vm441_vm0, %v1777_v43, -inf }
 0x151   : > { %464 = vmax.xlane.f32.xlu1 %v445_v35  ;;  %458 = vmax.xlane.f32.xlu0 %v1774_v36  ;;  %v1315_v37 = vpop.f32.mrb[4].mxu0  ;;  %v1323_v38 = vpop.f32.mrb[4].mxu1 }
 0x152   : > { %v392_v39 = vpop.f32.mrb[5].mxu0  ;;  %v424_v40 = vpop.f32.mrb[5].mxu1  ;;  %v1787_v49 = vadd.f32 %v1315_v37, %v1174_v18  ;;  %v1831_v63 = vadd.f32 %v1323_v38, %v1174_v18 }
 0x153   : > { %v1316_v41 = vpop.f32.mrb[6].mxu0  ;;  %v1324_v42 = vpop.f32.mrb[6].mxu1  ;;  %v1805_v55 = vadd.f32 %v1174_v18, %v392_v39  ;;  %v1810_v57 = vadd.f32 %v1174_v18, %v424_v40 }
 0x154   : > { %v395_v47 = vpop.f32.mrb[7].mxu0  ;;  %v427_v48 = vpop.f32.mrb[7].mxu1  ;;  %v1789_v50 = vadd.f32 %v1316_v41, %v1174_v18  ;;  %v448_v54 = vsel %vm441_vm0, %v1787_v49, -inf  ;;  %v1833_v0 = vadd.f32 %v1324_v42, %v1174_v18  ;;  %v456_v2 = vsel %vm441_vm0, %v1831_v63, -inf }
 0x155   : > { %480 = vmax.xlane.f32.xlu1 %v453_v45  ;;  %474 = vmax.xlane.f32.xlu0 %v450_v46  ;;  %v1807_v56 = vadd.f32 %v1174_v18, %v395_v47  ;;  %v1812_v58 = vadd.f32 %v1174_v18, %v427_v48  ;;  %v446_v60 = vsel %vm441_vm0, %v1805_v55, -inf  ;;  %v454_v62 = vsel %vm441_vm0, %v1810_v57, -inf }
 0x156   : > { %v1800_v53 = vsel %vm441_vm0, %v1789_v50, -inf  ;;  %v1839_v1 = vsel %vm441_vm0, %v1833_v0, -inf }
 0x157   : > { %v1817_v59 = vsel %vm441_vm0, %v1807_v56, -inf  ;;  %v1826_v61 = vsel %vm441_vm0, %v1812_v58, -inf }
 0x159   : > { %476 = vmax.xlane.f32.xlu1 %v451_v51  ;;  %460 = vmax.xlane.f32.xlu0 %v443_v52 }
 0x15d   : > { %472 = vmax.xlane.f32.xlu1 %v1800_v53  ;;  %470 = vmax.xlane.f32.xlu0 %v448_v54 }
 0x161   : > { %468 = vmax.xlane.f32.xlu1 %v1817_v59  ;;  %466 = vmax.xlane.f32.xlu0 %v446_v60 }
 0x165   : > { %484 = vmax.xlane.f32.xlu1 %v1826_v61  ;;  %482 = vmax.xlane.f32.xlu0 %v454_v62 }
 0x169   : > { %488 = vmax.xlane.f32.xlu1 %v1839_v1  ;;  %486 = vmax.xlane.f32.xlu0 %v456_v2 }
 0x1da   : > { %v479_v3 = vpop.xlane.xlu0 %478  ;;  %v463_v4 = vpop.xlane.xlu1 %462 }
 0x1db   : > { %vm492_vm1 = vcmp.ge.f32.partialorder %v444_v32, %v463_v4  ;;  %vm500_vm2 = vcmp.ge.f32.partialorder %v452_v31, %v479_v3 }
 0x1dc   : > { %v1845_v5 = vsel %vm492_vm1, -inf, %v444_v32  ;;  %v1850_v9 = vsel %vm500_vm2, -inf, %v452_v31 }
 0x1dd   : > { %526 = vmax.xlane.f32.xlu0 %v1845_v5 }
 0x1de   : > { %v465_v6 = vpop.xlane.xlu1 %464  ;;  %v459_v7 = vpop.xlane.xlu0 %458 }
 0x1df   : > { %vm493_vm3 = vcmp.ge.f32.partialorder %v445_v35, %v465_v6  ;;  %vm490_vm4 = vcmp.ge.f32.partialorder %v1774_v36, %v459_v7 }
 0x1e0   : > { %v1848_v8 = vsel %vm493_vm3, -inf, %v445_v35  ;;  %v1858_v13 = vsel %vm490_vm4, -inf, %v1774_v36 }
 0x1e1   : > { %528 = vmax.xlane.f32.xlu1 %v1848_v8  ;;  %542 = vmax.xlane.f32.xlu0 %v1850_v9 }
 0x1e2   : > { %v481_v10 = vpop.xlane.xlu1 %480  ;;  %v475_v11 = vpop.xlane.xlu0 %474 }
 0x1e3   : > { %vm501_vm5 = vcmp.ge.f32.partialorder %v453_v45, %v481_v10  ;;  %vm498_vm6 = vcmp.ge.f32.partialorder %v450_v46, %v475_v11 }
 0x1e4   : > { %v1855_v12 = vsel %vm501_vm5, -inf, %v453_v45  ;;  %v1862_v16 = vsel %vm498_vm6, -inf, %v450_v46 }
 0x1e5   : > { %544 = vmax.xlane.f32.xlu1 %v1855_v12  ;;  %522 = vmax.xlane.f32.xlu0 %v1858_v13 }
 0x1e6   : > { %v477_v14 = vpop.xlane.xlu1 %476  ;;  %v461_v15 = vpop.xlane.xlu0 %460 }
 0x1e7   : > { %vm491_vm7 = vcmp.ge.f32.partialorder %v443_v52, %v461_v15  ;;  %vm499_vm8 = vcmp.ge.f32.partialorder %v451_v51, %v477_v14 }
 0x1e8   : > { %v507_v18 = vsel %vm491_vm7, -inf, %v443_v52  ;;  %v1865_v23 = vsel %vm499_vm8, -inf, %v451_v51 }
 0x1e9   : > { %538 = vmax.xlane.f32.xlu0 %v1862_v16  ;;  %524 = vmax.xlane.f32.xlu1 %v507_v18 }
 0x1ea   : > { %v473_v19 = vpop.xlane.xlu1 %472  ;;  %v471_v20 = vpop.xlane.xlu0 %470 }
 0x1eb   : > { %vm496_vm9 = vcmp.ge.f32.partialorder %v448_v54, %v471_v20  ;;  %vm497_vm10 = vcmp.ge.f32.partialorder %v1800_v53, %v473_v19 }
 0x1ec   : > { %v1867_v24 = vsel %vm496_vm9, -inf, %v448_v54  ;;  %v1873_v29 = vsel %vm497_vm10, -inf, %v1800_v53 }
 0x1ed   : > { %540 = vmax.xlane.f32.xlu1 %v1865_v23  ;;  %534 = vmax.xlane.f32.xlu0 %v1867_v24 }
 0x1ee   : > { %v469_v25 = vpop.xlane.xlu1 %468  ;;  %v467_v26 = vpop.xlane.xlu0 %466 }
 0x1ef   : > { %vm494_vm11 = vcmp.ge.f32.partialorder %v446_v60, %v467_v26  ;;  %vm495_vm12 = vcmp.ge.f32.partialorder %v1817_v59, %v469_v25 }
 0x1f0   : > { %v1875_v30 = vsel %vm494_vm11, -inf, %v446_v60  ;;  %v1881_v35 = vsel %vm495_vm12, -inf, %v1817_v59 }
 0x1f1   : > { %536 = vmax.xlane.f32.xlu1 %v1873_v29  ;;  %530 = vmax.xlane.f32.xlu0 %v1875_v30 }
 0x1f2   : > { %v485_v31 = vpop.xlane.xlu1 %484  ;;  %v483_v32 = vpop.xlane.xlu0 %482 }
 0x1f3   : > { %vm502_vm13 = vcmp.ge.f32.partialorder %v454_v62, %v483_v32  ;;  %vm503_vm14 = vcmp.ge.f32.partialorder %v1826_v61, %v485_v31 }
 0x1f4   : > { %v1883_v36 = vsel %vm502_vm13, -inf, %v454_v62  ;;  %v1889_v39 = vsel %vm503_vm14, -inf, %v1826_v61 }
 0x1f5   : > { %532 = vmax.xlane.f32.xlu1 %v1881_v35  ;;  %546 = vmax.xlane.f32.xlu0 %v1883_v36 }
 0x1f6   : > { %v489_v37 = vpop.xlane.xlu1 %488  ;;  %v487_v38 = vpop.xlane.xlu0 %486 }
 0x1f7   : > { %vm504_vm15 = vcmp.ge.f32.partialorder %v456_v2, %v487_v38  ;;  %vm505_vm1 = vcmp.ge.f32.partialorder %v1839_v1, %v489_v37 }
 0x1f8   : > { %v520_v40 = vsel %vm504_vm15, -inf, %v456_v2  ;;  %v1894_v41 = vsel %vm505_vm1, -inf, %v1839_v1 }
 0x1f9   : > { %548 = vmax.xlane.f32.xlu1 %v1889_v39  ;;  %550 = vmax.xlane.f32.xlu0 %v520_v40 }
 0x1fd   : > { %552 = vmax.xlane.f32.xlu1 %v1894_v41 }
 0x26a   : > { %v527_v42 = vpop.xlane.xlu0 %526 }
 0x26b   : > { %vm556_vm2 = vcmp.ge.f32.partialorder %v1845_v5, %v527_v42 }
 0x26c   : > { %v1899_v45 = vsel %vm556_vm2, -inf, %v1845_v5 }
 0x26d   : > { %590 = vmax.xlane.f32.xlu0 %v1899_v45 }
 0x26e   : > { %v529_v46 = vpop.xlane.xlu1 %528  ;;  %v543_v47 = vpop.xlane.xlu0 %542 }
 0x26f   : > { %vm557_vm3 = vcmp.ge.f32.partialorder %v1848_v8, %v529_v46  ;;  %vm564_vm4 = vcmp.ge.f32.partialorder %v1850_v9, %v543_v47 }
 0x270   : > { %v1905_v48 = vsel %vm557_vm3, -inf, %v1848_v8  ;;  %v1908_v51 = vsel %vm564_vm4, -inf, %v1850_v9 }
 0x271   : > { %592 = vmax.xlane.f32.xlu1 %v1905_v48  ;;  %606 = vmax.xlane.f32.xlu0 %v1908_v51 }
 0x272   : > { %v545_v52 = vpop.xlane.xlu1 %544  ;;  %v523_v53 = vpop.xlane.xlu0 %522 }
 0x273   : > { %vm565_vm5 = vcmp.ge.f32.partialorder %v1855_v12, %v545_v52  ;;  %vm554_vm6 = vcmp.ge.f32.partialorder %v1858_v13, %v523_v53 }
 0x274   : > { %v1915_v54 = vsel %vm565_vm5, -inf, %v1855_v12  ;;  %v1918_v59 = vsel %vm554_vm6, -inf, %v1858_v13 }
 0x275   : > { %608 = vmax.xlane.f32.xlu1 %v1915_v54  ;;  %586 = vmax.xlane.f32.xlu0 %v1918_v59 }
 0x276   : > { %v525_v60 = vpop.xlane.xlu1 %524  ;;  %v539_v61 = vpop.xlane.xlu0 %538 }
 0x277   : > { %vm555_vm7 = vcmp.ge.f32.partialorder %v507_v18, %v525_v60  ;;  %vm562_vm8 = vcmp.ge.f32.partialorder %v1862_v16, %v539_v61 }
 0x278   : > { %v1923_v62 = vsel %vm555_vm7, -inf, %v507_v18  ;;  %v1926_v1 = vsel %vm562_vm8, -inf, %v1862_v16 }
 0x279   : > { %588 = vmax.xlane.f32.xlu1 %v1923_v62  ;;  %602 = vmax.xlane.f32.xlu0 %v1926_v1 }
 0x27a   : > { %v541_v2 = vpop.xlane.xlu1 %540  ;;  %v535_v3 = vpop.xlane.xlu0 %534 }
 0x27b   : > { %vm563_vm9 = vcmp.ge.f32.partialorder %v1865_v23, %v541_v2  ;;  %vm560_vm10 = vcmp.ge.f32.partialorder %v1867_v24, %v535_v3 }
 0x27c   : > { %v1933_v4 = vsel %vm563_vm9, -inf, %v1865_v23  ;;  %v1936_v5 = vsel %vm560_vm10, -inf, %v1867_v24 }
 0x27d   : > { %604 = vmax.xlane.f32.xlu1 %v1933_v4  ;;  %598 = vmax.xlane.f32.xlu0 %v1936_v5 }
 0x27e   : > { %v537_v6 = vpop.xlane.xlu1 %536  ;;  %v531_v7 = vpop.xlane.xlu0 %530 }
 0x27f   : > { %vm561_vm11 = vcmp.ge.f32.partialorder %v1873_v29, %v537_v6  ;;  %vm558_vm12 = vcmp.ge.f32.partialorder %v1875_v30, %v531_v7 }
 0x280   : > { %v1943_v8 = vsel %vm561_vm11, -inf, %v1873_v29  ;;  %v1946_v9 = vsel %vm558_vm12, -inf, %v1875_v30 }
 0x281   : > { %600 = vmax.xlane.f32.xlu1 %v1943_v8  ;;  %594 = vmax.xlane.f32.xlu0 %v1946_v9 }
 0x282   : > { %v533_v10 = vpop.xlane.xlu1 %532  ;;  %v547_v11 = vpop.xlane.xlu0 %546 }
 0x283   : > { %vm559_vm13 = vcmp.ge.f32.partialorder %v1881_v35, %v533_v10  ;;  %vm566_vm14 = vcmp.ge.f32.partialorder %v1883_v36, %v547_v11 }
 0x284   : > { %v1953_v12 = vsel %vm559_vm13, -inf, %v1881_v35  ;;  %v1956_v13 = vsel %vm566_vm14, -inf, %v1883_v36 }
 0x285   : > { %596 = vmax.xlane.f32.xlu1 %v1953_v12  ;;  %610 = vmax.xlane.f32.xlu0 %v1956_v13 }
 0x286   : > { %v549_v14 = vpop.xlane.xlu1 %548  ;;  %v551_v15 = vpop.xlane.xlu0 %550 }
 0x287   : > { %vm567_vm15 = vcmp.ge.f32.partialorder %v1889_v39, %v549_v14  ;;  %vm568_vm1 = vcmp.ge.f32.partialorder %v520_v40, %v551_v15 }
 0x288   : > { %v1961_v16 = vsel %vm568_vm1, -inf, %v520_v40  ;;  %v1964_v18 = vsel %vm567_vm15, -inf, %v1889_v39 }
 0x289   : > { %612 = vmax.xlane.f32.xlu1 %v1964_v18  ;;  %614 = vmax.xlane.f32.xlu0 %v1961_v16 }
 0x28a   : > { %v553_v19 = vpop.xlane.xlu1 %552 }
 0x28b   : > { %vm569_vm2 = vcmp.ge.f32.partialorder %v1894_v41, %v553_v19 }
 0x28c   : > { %v1970_v20 = vsel %vm569_vm2, -inf, %v1894_v41 }
 0x28d   : > { %616 = vmax.xlane.f32.xlu1 %v1970_v20 }
 0x2fa   : > { %v591_v23 = vpop.xlane.xlu0 %590 }
 0x2fb   : > { %vm620_vm3 = vcmp.ge.f32.partialorder %v1899_v45, %v591_v23 }
 0x2fc   : > { %v1975_v24 = vsel %vm620_vm3, -inf, %v1899_v45 }
 0x2fd   : > { %654 = vmax.xlane.f32.xlu0 %v1975_v24 }
 0x2fe   : > { %v593_v25 = vpop.xlane.xlu1 %592  ;;  %v607_v26 = vpop.xlane.xlu0 %606 }
 0x2ff   : > { %vm621_vm4 = vcmp.ge.f32.partialorder %v1905_v48, %v593_v25  ;;  %vm628_vm5 = vcmp.ge.f32.partialorder %v1908_v51, %v607_v26 }
 0x300   : > { %v1981_v29 = vsel %vm621_vm4, -inf, %v1905_v48  ;;  %v1984_v30 = vsel %vm628_vm5, -inf, %v1908_v51 }
 0x301   : > { %656 = vmax.xlane.f32.xlu1 %v1981_v29  ;;  %670 = vmax.xlane.f32.xlu0 %v1984_v30 }
 0x302   : > { %v609_v31 = vpop.xlane.xlu1 %608  ;;  %v587_v32 = vpop.xlane.xlu0 %586 }
 0x303   : > { %vm629_vm6 = vcmp.ge.f32.partialorder %v1915_v54, %v609_v31  ;;  %vm618_vm7 = vcmp.ge.f32.partialorder %v1918_v59, %v587_v32 }
 0x304   : > { %v1991_v35 = vsel %vm629_vm6, -inf, %v1915_v54  ;;  %v1994_v36 = vsel %vm618_vm7, -inf, %v1918_v59 }
 0x305   : > { %672 = vmax.xlane.f32.xlu1 %v1991_v35  ;;  %650 = vmax.xlane.f32.xlu0 %v1994_v36 }
 0x306   : > { %v589_v37 = vpop.xlane.xlu1 %588  ;;  %v603_v38 = vpop.xlane.xlu0 %602 }
 0x307   : > { %vm619_vm8 = vcmp.ge.f32.partialorder %v1923_v62, %v589_v37  ;;  %vm626_vm9 = vcmp.ge.f32.partialorder %v1926_v1, %v603_v38 }
 0x308   : > { %v2001_v39 = vsel %vm619_vm8, -inf, %v1923_v62  ;;  %v2004_v40 = vsel %vm626_vm9, -inf, %v1926_v1 }
 0x309   : > { %652 = vmax.xlane.f32.xlu1 %v2001_v39  ;;  %666 = vmax.xlane.f32.xlu0 %v2004_v40 }
 0x30a   : > { %v605_v41 = vpop.xlane.xlu1 %604  ;;  %v599_v42 = vpop.xlane.xlu0 %598 }
 0x30b   : > { %vm627_vm10 = vcmp.ge.f32.partialorder %v1933_v4, %v605_v41  ;;  %vm624_vm11 = vcmp.ge.f32.partialorder %v1936_v5, %v599_v42 }
 0x30c   : > { %v2011_v45 = vsel %vm627_vm10, -inf, %v1933_v4  ;;  %v2014_v46 = vsel %vm624_vm11, -inf, %v1936_v5 }
 0x30d   : > { %668 = vmax.xlane.f32.xlu1 %v2011_v45  ;;  %662 = vmax.xlane.f32.xlu0 %v2014_v46 }
 0x30e   : > { %v601_v47 = vpop.xlane.xlu1 %600  ;;  %v595_v48 = vpop.xlane.xlu0 %594 }
 0x30f   : > { %vm625_vm12 = vcmp.ge.f32.partialorder %v1943_v8, %v601_v47  ;;  %vm622_vm13 = vcmp.ge.f32.partialorder %v1946_v9, %v595_v48 }
 0x310   : > { %v2021_v51 = vsel %vm625_vm12, -inf, %v1943_v8  ;;  %v2024_v52 = vsel %vm622_vm13, -inf, %v1946_v9 }
 0x311   : > { %664 = vmax.xlane.f32.xlu1 %v2021_v51  ;;  %658 = vmax.xlane.f32.xlu0 %v2024_v52 }
 0x312   : > { %v597_v53 = vpop.xlane.xlu1 %596  ;;  %v611_v54 = vpop.xlane.xlu0 %610 }
 0x313   : > { %vm623_vm14 = vcmp.ge.f32.partialorder %v1953_v12, %v597_v53  ;;  %vm630_vm15 = vcmp.ge.f32.partialorder %v1956_v13, %v611_v54 }
 0x314   : > { %v2031_v59 = vsel %vm623_vm14, -inf, %v1953_v12  ;;  %v2034_v60 = vsel %vm630_vm15, -inf, %v1956_v13 }
 0x315   : > { %660 = vmax.xlane.f32.xlu1 %v2031_v59  ;;  %674 = vmax.xlane.f32.xlu0 %v2034_v60 }
 0x316   : > { %v613_v61 = vpop.xlane.xlu1 %612  ;;  %v615_v62 = vpop.xlane.xlu0 %614 }
 0x317   : > { %vm631_vm1 = vcmp.ge.f32.partialorder %v1964_v18, %v613_v61  ;;  %vm632_vm2 = vcmp.ge.f32.partialorder %v1961_v16, %v615_v62 }
 0x318   : > { %v2041_v1 = vsel %vm631_vm1, -inf, %v1964_v18  ;;  %v2044_v2 = vsel %vm632_vm2, -inf, %v1961_v16 }
 0x319   : > { %676 = vmax.xlane.f32.xlu1 %v2041_v1  ;;  %678 = vmax.xlane.f32.xlu0 %v2044_v2 }
 0x31a   : > { %v617_v3 = vpop.xlane.xlu1 %616 }
 0x31b   : > { %vm633_vm3 = vcmp.ge.f32.partialorder %v1970_v20, %v617_v3 }
 0x31c   : > { %v2050_v4 = vsel %vm633_vm3, -inf, %v1970_v20 }
 0x31d   : > { %680 = vmax.xlane.f32.xlu1 %v2050_v4 }
 0x38a   : > { %v655_v5 = vpop.xlane.xlu0 %654 }
 0x38b   : > { %vm684_vm4 = vcmp.ge.f32.partialorder %v1975_v24, %v655_v5 }
 0x38c   : > { %v2055_v6 = vsel %vm684_vm4, -inf, %v1975_v24 }
 0x38d   : > { %718 = vmax.xlane.f32.xlu0 %v2055_v6 }
 0x38e   : > { %v657_v7 = vpop.xlane.xlu1 %656  ;;  %v671_v8 = vpop.xlane.xlu0 %670 }
 0x38f   : > { %vm685_vm5 = vcmp.ge.f32.partialorder %v1981_v29, %v657_v7  ;;  %vm692_vm6 = vcmp.ge.f32.partialorder %v1984_v30, %v671_v8 }
 0x390   : > { %v2061_v9 = vsel %vm685_vm5, -inf, %v1981_v29  ;;  %v2064_v10 = vsel %vm692_vm6, -inf, %v1984_v30 }
 0x391   : > { %720 = vmax.xlane.f32.xlu1 %v2061_v9  ;;  %734 = vmax.xlane.f32.xlu0 %v2064_v10 }
 0x392   : > { %v673_v11 = vpop.xlane.xlu1 %672  ;;  %v651_v12 = vpop.xlane.xlu0 %650 }
 0x393   : > { %vm693_vm7 = vcmp.ge.f32.partialorder %v1991_v35, %v673_v11  ;;  %vm682_vm8 = vcmp.ge.f32.partialorder %v1994_v36, %v651_v12 }
 0x394   : > { %v2071_v13 = vsel %vm693_vm7, -inf, %v1991_v35  ;;  %v2074_v14 = vsel %vm682_vm8, -inf, %v1994_v36 }
 0x395   : > { %736 = vmax.xlane.f32.xlu1 %v2071_v13  ;;  %714 = vmax.xlane.f32.xlu0 %v2074_v14 }
 0x396   : > { %v653_v15 = vpop.xlane.xlu1 %652  ;;  %v667_v16 = vpop.xlane.xlu0 %666 }
 0x397   : > { %vm683_vm9 = vcmp.ge.f32.partialorder %v2001_v39, %v653_v15  ;;  %vm690_vm10 = vcmp.ge.f32.partialorder %v2004_v40, %v667_v16 }
 0x398   : > { %v2081_v18 = vsel %vm683_vm9, -inf, %v2001_v39  ;;  %v2084_v19 = vsel %vm690_vm10, -inf, %v2004_v40 }
 0x399   : > { %716 = vmax.xlane.f32.xlu1 %v2081_v18  ;;  %730 = vmax.xlane.f32.xlu0 %v2084_v19 }
 0x39a   : > { %v669_v20 = vpop.xlane.xlu1 %668  ;;  %v663_v23 = vpop.xlane.xlu0 %662 }
 0x39b   : > { %vm691_vm11 = vcmp.ge.f32.partialorder %v2011_v45, %v669_v20  ;;  %vm688_vm12 = vcmp.ge.f32.partialorder %v2014_v46, %v663_v23 }
 0x39c   : > { %v2091_v24 = vsel %vm691_vm11, -inf, %v2011_v45  ;;  %v2094_v25 = vsel %vm688_vm12, -inf, %v2014_v46 }
 0x39d   : > { %732 = vmax.xlane.f32.xlu1 %v2091_v24  ;;  %726 = vmax.xlane.f32.xlu0 %v2094_v25 }
 0x39e   : > { %v665_v26 = vpop.xlane.xlu1 %664  ;;  %v659_v29 = vpop.xlane.xlu0 %658 }
 0x39f   : > { %vm689_vm13 = vcmp.ge.f32.partialorder %v2021_v51, %v665_v26  ;;  %vm686_vm14 = vcmp.ge.f32.partialorder %v2024_v52, %v659_v29 }
 0x3a0   : > { %v2101_v30 = vsel %vm689_vm13, -inf, %v2021_v51  ;;  %v2104_v31 = vsel %vm686_vm14, -inf, %v2024_v52 }
 0x3a1   : > { %728 = vmax.xlane.f32.xlu1 %v2101_v30  ;;  %722 = vmax.xlane.f32.xlu0 %v2104_v31 }
 0x3a2   : > { %v661_v32 = vpop.xlane.xlu1 %660  ;;  %v675_v35 = vpop.xlane.xlu0 %674 }
 0x3a3   : > { %vm687_vm15 = vcmp.ge.f32.partialorder %v2031_v59, %v661_v32  ;;  %vm694_vm1 = vcmp.ge.f32.partialorder %v2034_v60, %v675_v35 }
 0x3a4   : > { %v2111_v36 = vsel %vm687_vm15, -inf, %v2031_v59  ;;  %v2114_v37 = vsel %vm694_vm1, -inf, %v2034_v60 }
 0x3a5   : > { %724 = vmax.xlane.f32.xlu1 %v2111_v36  ;;  %738 = vmax.xlane.f32.xlu0 %v2114_v37 }
 0x3a6   : > { %v677_v38 = vpop.xlane.xlu1 %676  ;;  %v679_v39 = vpop.xlane.xlu0 %678 }
 0x3a7   : > { %vm695_vm2 = vcmp.ge.f32.partialorder %v2041_v1, %v677_v38  ;;  %vm696_vm3 = vcmp.ge.f32.partialorder %v2044_v2, %v679_v39 }
 0x3a8   : > { %v2121_v40 = vsel %vm695_vm2, -inf, %v2041_v1  ;;  %v2124_v41 = vsel %vm696_vm3, -inf, %v2044_v2 }
 0x3a9   : > { %740 = vmax.xlane.f32.xlu1 %v2121_v40  ;;  %742 = vmax.xlane.f32.xlu0 %v2124_v41 }
 0x3aa   : > { %v681_v42 = vpop.xlane.xlu1 %680 }
 0x3ab   : > { %vm697_vm4 = vcmp.ge.f32.partialorder %v2050_v4, %v681_v42 }
 0x3ac   : > { %v2130_v45 = vsel %vm697_vm4, -inf, %v2050_v4 }
 0x3ad   : > { %744 = vmax.xlane.f32.xlu1 %v2130_v45 }
 0x41a   : > { %v719_v46 = vpop.xlane.xlu0 %718 }
 0x41b   : > { %vm748_vm5 = vcmp.ge.f32.partialorder %v2055_v6, %v719_v46 }
 0x41c   : > { %v2135_v47 = vsel %vm748_vm5, -inf, %v2055_v6 }
 0x41d   : > { %782 = vmax.xlane.f32.xlu0 %v2135_v47 }
 0x41e   : > { %v721_v48 = vpop.xlane.xlu1 %720  ;;  %v735_v51 = vpop.xlane.xlu0 %734 }
 0x41f   : > { %vm749_vm6 = vcmp.ge.f32.partialorder %v2061_v9, %v721_v48  ;;  %vm756_vm7 = vcmp.ge.f32.partialorder %v2064_v10, %v735_v51 }
 0x420   : > { %v2141_v52 = vsel %vm749_vm6, -inf, %v2061_v9  ;;  %v2144_v53 = vsel %vm756_vm7, -inf, %v2064_v10 }
 0x421   : > { %784 = vmax.xlane.f32.xlu1 %v2141_v52  ;;  %798 = vmax.xlane.f32.xlu0 %v2144_v53 }
 0x422   : > { %v737_v54 = vpop.xlane.xlu1 %736  ;;  %v715_v59 = vpop.xlane.xlu0 %714 }
 0x423   : > { %vm757_vm8 = vcmp.ge.f32.partialorder %v2071_v13, %v737_v54  ;;  %vm746_vm9 = vcmp.ge.f32.partialorder %v2074_v14, %v715_v59 }
 0x424   : > { %v2151_v60 = vsel %vm757_vm8, -inf, %v2071_v13  ;;  %v2154_v61 = vsel %vm746_vm9, -inf, %v2074_v14 }
 0x425   : > { %800 = vmax.xlane.f32.xlu1 %v2151_v60  ;;  %778 = vmax.xlane.f32.xlu0 %v2154_v61 }
 0x426   : > { %v717_v62 = vpop.xlane.xlu1 %716  ;;  %v731_v1 = vpop.xlane.xlu0 %730 }
 0x427   : > { %vm747_vm10 = vcmp.ge.f32.partialorder %v2081_v18, %v717_v62  ;;  %vm754_vm11 = vcmp.ge.f32.partialorder %v2084_v19, %v731_v1 }
 0x428   : > { %v2161_v2 = vsel %vm747_vm10, -inf, %v2081_v18  ;;  %v2164_v3 = vsel %vm754_vm11, -inf, %v2084_v19 }
 0x429   : > { %780 = vmax.xlane.f32.xlu1 %v2161_v2  ;;  %794 = vmax.xlane.f32.xlu0 %v2164_v3 }
 0x42a   : > { %v733_v4 = vpop.xlane.xlu1 %732  ;;  %v727_v5 = vpop.xlane.xlu0 %726 }
 0x42b   : > { %vm755_vm12 = vcmp.ge.f32.partialorder %v2091_v24, %v733_v4  ;;  %vm752_vm13 = vcmp.ge.f32.partialorder %v2094_v25, %v727_v5 }
 0x42c   : > { %v2171_v6 = vsel %vm755_vm12, -inf, %v2091_v24  ;;  %v2174_v7 = vsel %vm752_vm13, -inf, %v2094_v25 }
 0x42d   : > { %796 = vmax.xlane.f32.xlu1 %v2171_v6  ;;  %790 = vmax.xlane.f32.xlu0 %v2174_v7 }
 0x42e   : > { %v729_v8 = vpop.xlane.xlu1 %728  ;;  %v723_v9 = vpop.xlane.xlu0 %722 }
 0x42f   : > { %vm753_vm14 = vcmp.ge.f32.partialorder %v2101_v30, %v729_v8  ;;  %vm750_vm15 = vcmp.ge.f32.partialorder %v2104_v31, %v723_v9 }
 0x430   : > { %v2181_v10 = vsel %vm753_vm14, -inf, %v2101_v30  ;;  %v2184_v11 = vsel %vm750_vm15, -inf, %v2104_v31 }
 0x431   : > { %792 = vmax.xlane.f32.xlu1 %v2181_v10  ;;  %786 = vmax.xlane.f32.xlu0 %v2184_v11 }
 0x432   : > { %v725_v12 = vpop.xlane.xlu1 %724  ;;  %v739_v13 = vpop.xlane.xlu0 %738 }
 0x433   : > { %vm751_vm1 = vcmp.ge.f32.partialorder %v2111_v36, %v725_v12  ;;  %vm758_vm2 = vcmp.ge.f32.partialorder %v2114_v37, %v739_v13 }
 0x434   : > { %v2191_v14 = vsel %vm751_vm1, -inf, %v2111_v36  ;;  %v2194_v15 = vsel %vm758_vm2, -inf, %v2114_v37 }
 0x435   : > { %788 = vmax.xlane.f32.xlu1 %v2191_v14  ;;  %802 = vmax.xlane.f32.xlu0 %v2194_v15 }
 0x436   : > { %v741_v16 = vpop.xlane.xlu1 %740  ;;  %v743_v18 = vpop.xlane.xlu0 %742 }
 0x437   : > { %vm759_vm3 = vcmp.ge.f32.partialorder %v2121_v40, %v741_v16  ;;  %vm760_vm4 = vcmp.ge.f32.partialorder %v2124_v41, %v743_v18 }
 0x438   : > { %v2201_v19 = vsel %vm759_vm3, -inf, %v2121_v40  ;;  %v2204_v20 = vsel %vm760_vm4, -inf, %v2124_v41 }
 0x439   : > { %804 = vmax.xlane.f32.xlu1 %v2201_v19  ;;  %806 = vmax.xlane.f32.xlu0 %v2204_v20 }
 0x43a   : > { %v745_v23 = vpop.xlane.xlu1 %744 }
 0x43b   : > { %vm761_vm5 = vcmp.ge.f32.partialorder %v2130_v45, %v745_v23 }
 0x43c   : > { %v2210_v24 = vsel %vm761_vm5, -inf, %v2130_v45 }
 0x43d   : > { %808 = vmax.xlane.f32.xlu1 %v2210_v24 }
 0x4aa   : > { %v783_v25 = vpop.xlane.xlu0 %782 }
 0x4ab   : > { %vm812_vm6 = vcmp.ge.f32.partialorder %v2135_v47, %v783_v25 }
 0x4ac   : > { %v2215_v26 = vsel %vm812_vm6, -inf, %v2135_v47 }
 0x4ad   : > { %846 = vmax.xlane.f32.xlu0 %v2215_v26 }
 0x4ae   : > { %v785_v29 = vpop.xlane.xlu1 %784  ;;  %v799_v30 = vpop.xlane.xlu0 %798 }
 0x4af   : > { %vm813_vm7 = vcmp.ge.f32.partialorder %v2141_v52, %v785_v29  ;;  %vm820_vm8 = vcmp.ge.f32.partialorder %v2144_v53, %v799_v30 }
 0x4b0   : > { %v2221_v31 = vsel %vm813_vm7, -inf, %v2141_v52  ;;  %v2224_v32 = vsel %vm820_vm8, -inf, %v2144_v53 }
 0x4b1   : > { %848 = vmax.xlane.f32.xlu1 %v2221_v31  ;;  %862 = vmax.xlane.f32.xlu0 %v2224_v32 }
 0x4b2   : > { %v801_v35 = vpop.xlane.xlu1 %800  ;;  %v779_v36 = vpop.xlane.xlu0 %778 }
 0x4b3   : > { %vm821_vm9 = vcmp.ge.f32.partialorder %v2151_v60, %v801_v35  ;;  %vm810_vm10 = vcmp.ge.f32.partialorder %v2154_v61, %v779_v36 }
 0x4b4   : > { %v2231_v37 = vsel %vm821_vm9, -inf, %v2151_v60  ;;  %v2234_v38 = vsel %vm810_vm10, -inf, %v2154_v61 }
 0x4b5   : > { %864 = vmax.xlane.f32.xlu1 %v2231_v37  ;;  %842 = vmax.xlane.f32.xlu0 %v2234_v38 }
 0x4b6   : > { %v781_v39 = vpop.xlane.xlu1 %780  ;;  %v795_v40 = vpop.xlane.xlu0 %794 }
 0x4b7   : > { %vm811_vm11 = vcmp.ge.f32.partialorder %v2161_v2, %v781_v39  ;;  %vm818_vm12 = vcmp.ge.f32.partialorder %v2164_v3, %v795_v40 }
 0x4b8   : > { %v2241_v41 = vsel %vm811_vm11, -inf, %v2161_v2  ;;  %v2244_v42 = vsel %vm818_vm12, -inf, %v2164_v3 }
 0x4b9   : > { %844 = vmax.xlane.f32.xlu1 %v2241_v41  ;;  %858 = vmax.xlane.f32.xlu0 %v2244_v42 }
 0x4ba   : > { %v797_v45 = vpop.xlane.xlu1 %796  ;;  %v791_v46 = vpop.xlane.xlu0 %790 }
 0x4bb   : > { %vm819_vm13 = vcmp.ge.f32.partialorder %v2171_v6, %v797_v45  ;;  %vm816_vm14 = vcmp.ge.f32.partialorder %v2174_v7, %v791_v46 }
 0x4bc   : > { %v2251_v47 = vsel %vm819_vm13, -inf, %v2171_v6  ;;  %v2254_v48 = vsel %vm816_vm14, -inf, %v2174_v7 }
 0x4bd   : > { %860 = vmax.xlane.f32.xlu1 %v2251_v47  ;;  %854 = vmax.xlane.f32.xlu0 %v2254_v48 }
 0x4be   : > { %v793_v51 = vpop.xlane.xlu1 %792  ;;  %v787_v52 = vpop.xlane.xlu0 %786 }
 0x4bf   : > { %vm817_vm15 = vcmp.ge.f32.partialorder %v2181_v10, %v793_v51  ;;  %vm814_vm1 = vcmp.ge.f32.partialorder %v2184_v11, %v787_v52 }
 0x4c0   : > { %v2261_v53 = vsel %vm817_vm15, -inf, %v2181_v10  ;;  %v2264_v54 = vsel %vm814_vm1, -inf, %v2184_v11 }
 0x4c1   : > { %856 = vmax.xlane.f32.xlu1 %v2261_v53  ;;  %850 = vmax.xlane.f32.xlu0 %v2264_v54 }
 0x4c2   : > { %v789_v59 = vpop.xlane.xlu1 %788  ;;  %v803_v60 = vpop.xlane.xlu0 %802 }
 0x4c3   : > { %vm815_vm2 = vcmp.ge.f32.partialorder %v2191_v14, %v789_v59  ;;  %vm822_vm3 = vcmp.ge.f32.partialorder %v2194_v15, %v803_v60 }
 0x4c4   : > { %v2271_v61 = vsel %vm815_vm2, -inf, %v2191_v14  ;;  %v2274_v62 = vsel %vm822_vm3, -inf, %v2194_v15 }
 0x4c5   : > { %852 = vmax.xlane.f32.xlu1 %v2271_v61  ;;  %866 = vmax.xlane.f32.xlu0 %v2274_v62 }
 0x4c6   : > { %v805_v1 = vpop.xlane.xlu1 %804  ;;  %v807_v2 = vpop.xlane.xlu0 %806 }
 0x4c7   : > { %vm823_vm4 = vcmp.ge.f32.partialorder %v2201_v19, %v805_v1  ;;  %vm824_vm5 = vcmp.ge.f32.partialorder %v2204_v20, %v807_v2 }
 0x4c8   : > { %v2281_v3 = vsel %vm823_vm4, -inf, %v2201_v19  ;;  %v2284_v4 = vsel %vm824_vm5, -inf, %v2204_v20 }
 0x4c9   : > { %868 = vmax.xlane.f32.xlu1 %v2281_v3  ;;  %870 = vmax.xlane.f32.xlu0 %v2284_v4 }
 0x4ca   : > { %v809_v5 = vpop.xlane.xlu1 %808 }
 0x4cb   : > { %vm825_vm6 = vcmp.ge.f32.partialorder %v2210_v24, %v809_v5 }
 0x4cc   : > { %v2290_v6 = vsel %vm825_vm6, -inf, %v2210_v24 }
 0x4cd   : > { %872 = vmax.xlane.f32.xlu1 %v2290_v6 }
 0x53a   : > { %v847_v7 = vpop.xlane.xlu0 %846 }
 0x53b   : > { %vm876_vm7 = vcmp.ge.f32.partialorder %v2215_v26, %v847_v7 }
 0x53c   : > { %v892_v8 = vsel %vm876_vm7, -inf, %v2215_v26 }
 0x53d   : > { %910 = vmax.xlane.f32.xlu0 %v892_v8 }
 0x53e   : > { %v849_v9 = vpop.xlane.xlu1 %848  ;;  %v863_v10 = vpop.xlane.xlu0 %862 }
 0x53f   : > { %vm877_vm8 = vcmp.ge.f32.partialorder %v2221_v31, %v849_v9  ;;  %vm884_vm9 = vcmp.ge.f32.partialorder %v2224_v32, %v863_v10 }
 0x540   : > { %v893_v11 = vsel %vm877_vm8, -inf, %v2221_v31  ;;  %v900_v12 = vsel %vm884_vm9, -inf, %v2224_v32 }
 0x541   : > { %912 = vmax.xlane.f32.xlu1 %v893_v11  ;;  %926 = vmax.xlane.f32.xlu0 %v900_v12 }
 0x542   : > { %v865_v13 = vpop.xlane.xlu1 %864  ;;  %v843_v14 = vpop.xlane.xlu0 %842 }
 0x543   : > { %vm885_vm10 = vcmp.ge.f32.partialorder %v2231_v37, %v865_v13  ;;  %vm874_vm11 = vcmp.ge.f32.partialorder %v2234_v38, %v843_v14 }
 0x544   : > { %v901_v15 = vsel %vm885_vm10, -inf, %v2231_v37  ;;  %v890_v16 = vsel %vm874_vm11, -inf, %v2234_v38 }
 0x545   : > { %928 = vmax.xlane.f32.xlu1 %v901_v15  ;;  %906 = vmax.xlane.f32.xlu0 %v890_v16 }
 0x546   : > { %v845_v18 = vpop.xlane.xlu1 %844  ;;  %v859_v19 = vpop.xlane.xlu0 %858 }
 0x547   : > { %vm875_vm12 = vcmp.ge.f32.partialorder %v2241_v41, %v845_v18  ;;  %vm882_vm13 = vcmp.ge.f32.partialorder %v2244_v42, %v859_v19 }
 0x548   : > { %v891_v20 = vsel %vm875_vm12, -inf, %v2241_v41  ;;  %v898_v23 = vsel %vm882_vm13, -inf, %v2244_v42 }
 0x549   : > { %908 = vmax.xlane.f32.xlu1 %v891_v20  ;;  %922 = vmax.xlane.f32.xlu0 %v898_v23 }
 0x54a   : > { %v861_v24 = vpop.xlane.xlu1 %860  ;;  %v855_v25 = vpop.xlane.xlu0 %854 }
 0x54b   : > { %vm883_vm14 = vcmp.ge.f32.partialorder %v2251_v47, %v861_v24  ;;  %vm880_vm15 = vcmp.ge.f32.partialorder %v2254_v48, %v855_v25 }
 0x54c   : > { %v899_v26 = vsel %vm883_vm14, -inf, %v2251_v47  ;;  %v896_v29 = vsel %vm880_vm15, -inf, %v2254_v48 }
 0x54d   : > { %924 = vmax.xlane.f32.xlu1 %v899_v26  ;;  %918 = vmax.xlane.f32.xlu0 %v896_v29 }
 0x54e   : > { %v857_v30 = vpop.xlane.xlu1 %856  ;;  %v851_v31 = vpop.xlane.xlu0 %850 }
 0x54f   : > { %vm881_vm1 = vcmp.ge.f32.partialorder %v2261_v53, %v857_v30  ;;  %vm878_vm2 = vcmp.ge.f32.partialorder %v2264_v54, %v851_v31 }
 0x550   : > { %v897_v32 = vsel %vm881_vm1, -inf, %v2261_v53  ;;  %v894_v35 = vsel %vm878_vm2, -inf, %v2264_v54 }
 0x551   : > { %920 = vmax.xlane.f32.xlu1 %v897_v32  ;;  %914 = vmax.xlane.f32.xlu0 %v894_v35 }
 0x552   : > { %v853_v36 = vpop.xlane.xlu1 %852  ;;  %v867_v37 = vpop.xlane.xlu0 %866 }
 0x553   : > { %vm879_vm3 = vcmp.ge.f32.partialorder %v2271_v61, %v853_v36  ;;  %vm886_vm4 = vcmp.ge.f32.partialorder %v2274_v62, %v867_v37 }
 0x554   : > { %v895_v38 = vsel %vm879_vm3, -inf, %v2271_v61  ;;  %v902_v39 = vsel %vm886_vm4, -inf, %v2274_v62 }
 0x555   : > { %916 = vmax.xlane.f32.xlu1 %v895_v38  ;;  %930 = vmax.xlane.f32.xlu0 %v902_v39 }
 0x556   : > { %v869_v40 = vpop.xlane.xlu1 %868  ;;  %v871_v41 = vpop.xlane.xlu0 %870 }
 0x557   : > { %vm887_vm5 = vcmp.ge.f32.partialorder %v2281_v3, %v869_v40  ;;  %vm888_vm6 = vcmp.ge.f32.partialorder %v2284_v4, %v871_v41 }
 0x558   : > { %v903_v42 = vsel %vm887_vm5, -inf, %v2281_v3  ;;  %v904_v45 = vsel %vm888_vm6, -inf, %v2284_v4 }
 0x559   : > { %932 = vmax.xlane.f32.xlu1 %v903_v42  ;;  %934 = vmax.xlane.f32.xlu0 %v904_v45 }
 0x55a   : > { %v873_v46 = vpop.xlane.xlu1 %872 }
 0x55b   : > { %vm889_vm7 = vcmp.ge.f32.partialorder %v2290_v6, %v873_v46 }
 0x55c   : > { %v905_v47 = vsel %vm889_vm7, -inf, %v2290_v6 }
 0x55d   : > { %936 = vmax.xlane.f32.xlu1 %v905_v47 }
 0x5ca   : > { %v911_v48 = vpop.xlane.xlu0 %910 }
 0x5cb   : > { %vm940_vm8 = vcmp.ge.f32.partialorder %v1750_v21, %v911_v48 }
 0x5cc   : > { %vm956_vm9 = vmand %vm441_vm0, %vm940_vm8 }
 0x5cd   : > { %v972_v53 = vsel %vm956_vm9, %v1750_v21, 0.0 }
 0x5ce   : > { %v913_v51 = vpop.xlane.xlu1 %912  ;;  %v927_v52 = vpop.xlane.xlu0 %926 }
 0x5cf   : > { %vm941_vm10 = vcmp.ge.f32.partialorder %v1756_v28, %v913_v51  ;;  %vm948_vm11 = vcmp.ge.f32.partialorder %v1752_v22, %v927_v52 }
 0x5d0   : > { %vm957_vm12 = vmand %vm441_vm0, %vm941_vm10 }
 0x5d1   : > { %v973_v54 = vsel %vm957_vm12, %v1756_v28, 0.0  ;;  %vm964_vm13 = vmand %vm441_vm0, %vm948_vm11 }
 0x5d2   : > { %v1238_v59 = vpack.c.bf16 %v973_v54, %v972_v53  ;;  %v929_v60 = vpop.xlane.xlu1 %928  ;;  %v907_v61 = vpop.xlane.xlu0 %906  ;;  %v980_v21 = vsel %vm964_vm13, %v1752_v22, 0.0 }
 0x5d3   : > { %vm949_vm14 = vcmp.ge.f32.partialorder %v1766_v34, %v929_v60  ;;  %vm938_vm15 = vcmp.ge.f32.partialorder %v1754_v27, %v907_v61 }
 0x5d4   : > { %1270 = vst [vmem:[%s2340_s8 + $0x8] sm:$0xff] %v1238_v59   ;;  %vm965_vm1 = vmand %vm441_vm0, %vm949_vm14 }
 0x5d5   : > { %v981_v28 = vsel %vm965_vm1, %v1766_v34, 0.0  ;;  %vm954_vm2 = vmand %vm441_vm0, %vm938_vm15 }
 0x5d6   : > { %v1258_v62 = vpack.c.bf16 %v981_v28, %v980_v21  ;;  %v909_v1 = vpop.xlane.xlu1 %908  ;;  %v923_v2 = vpop.xlane.xlu0 %922  ;;  %v970_v3 = vsel %vm954_vm2, %v1754_v27, 0.0 }
 0x5d7   : > { %vm939_vm3 = vcmp.ge.f32.partialorder %v1777_v43, %v909_v1  ;;  %vm946_vm4 = vcmp.ge.f32.partialorder %v1764_v33, %v923_v2 }
 0x5d8   : > { %1274 = vst [vmem:[%s2340_s8 + $0x28] sm:$0xff] %v1258_v62   ;;  %vm955_vm5 = vmand %vm441_vm0, %vm939_vm3 }
 0x5d9   : > { %v971_v22 = vsel %vm955_vm5, %v1777_v43, 0.0  ;;  %vm962_vm6 = vmand %vm441_vm0, %vm946_vm4 }
 0x5da   : > { %v1233_v34 = vpack.c.bf16 %v971_v22, %v970_v3  ;;  %v925_v4 = vpop.xlane.xlu1 %924  ;;  %v919_v5 = vpop.xlane.xlu0 %918  ;;  %v978_v6 = vsel %vm962_vm6, %v1764_v33, 0.0 }
 0x5db   : > { %vm947_vm7 = vcmp.ge.f32.partialorder %v1779_v44, %v925_v4  ;;  %vm944_vm8 = vcmp.ge.f32.partialorder %v1787_v49, %v919_v5 }
 0x5dc   : > { %1234 = vst [vmem:[%s2340_s8] sm:$0xff] %v1233_v34   ;;  %vm963_vm9 = vmand %vm441_vm0, %vm947_vm7 }
 0x5dd   : > { %v979_v27 = vsel %vm963_vm9, %v1779_v44, 0.0  ;;  %vm960_vm10 = vmand %vm441_vm0, %vm944_vm8 }
 0x5de   : > { %v1253_v43 = vpack.c.bf16 %v979_v27, %v978_v6  ;;  %v921_v7 = vpop.xlane.xlu1 %920  ;;  %v915_v8 = vpop.xlane.xlu0 %914  ;;  %v976_v9 = vsel %vm960_vm10, %v1787_v49, 0.0 }
 0x5df   : > { %vm945_vm11 = vcmp.ge.f32.partialorder %v1789_v50, %v921_v7  ;;  %vm942_vm12 = vcmp.ge.f32.partialorder %v1805_v55, %v915_v8 }
 0x5e0   : > { %1273 = vst [vmem:[%s2340_s8 + $0x20] sm:$0xff] %v1253_v43   ;;  %vm961_vm13 = vmand %vm441_vm0, %vm945_vm11 }
 0x5e1   : > { %v977_v33 = vsel %vm961_vm13, %v1789_v50, 0.0  ;;  %vm958_vm14 = vmand %vm441_vm0, %vm942_vm12 }
 0x5e2   : > { %v1248_v44 = vpack.c.bf16 %v977_v33, %v976_v9  ;;  %v917_v10 = vpop.xlane.xlu1 %916  ;;  %v931_v11 = vpop.xlane.xlu0 %930  ;;  %v974_v49 = vsel %vm958_vm14, %v1805_v55, 0.0 }
 0x5e3   : > { %vm943_vm15 = vcmp.ge.f32.partialorder %v1807_v56, %v917_v10  ;;  %vm950_vm1 = vcmp.ge.f32.partialorder %v1810_v57, %v931_v11 }
 0x5e4   : > { %1272 = vst [vmem:[%s2340_s8 + $0x18] sm:$0xff] %v1248_v44   ;;  %vm959_vm2 = vmand %vm441_vm0, %vm943_vm15 }
 0x5e5   : > { %v975_v50 = vsel %vm959_vm2, %v1807_v56, 0.0  ;;  %vm966_vm3 = vmand %vm441_vm0, %vm950_vm1 }
 0x5e6   : > { %v1243_v12 = vpack.c.bf16 %v975_v50, %v974_v49  ;;  %v933_v13 = vpop.xlane.xlu1 %932  ;;  %v935_v14 = vpop.xlane.xlu0 %934  ;;  %v982_v55 = vsel %vm966_vm3, %v1810_v57, 0.0 }
 0x5e7   : > { %vm951_vm4 = vcmp.ge.f32.partialorder %v1812_v58, %v933_v13  ;;  %vm952_vm5 = vcmp.ge.f32.partialorder %v1831_v63, %v935_v14 }
 0x5e8   : > { %1271 = vst [vmem:[%s2340_s8 + $0x10] sm:$0xff] %v1243_v12   ;;  %vm967_vm6 = vmand %vm441_vm0, %vm951_vm4 }
 0x5e9   : > { %v983_v56 = vsel %vm967_vm6, %v1812_v58, 0.0  ;;  %vm968_vm7 = vmand %vm441_vm0, %vm952_vm5 }
 0x5ea   : > { %v1263_v15 = vpack.c.bf16 %v983_v56, %v982_v55  ;;  %v937_v16 = vpop.xlane.xlu1 %936  ;;  %v984_v18 = vsel %vm968_vm7, %v1831_v63, 0.0 }
 0x5eb   : > { %vm953_vm8 = vcmp.ge.f32.partialorder %v1833_v0, %v937_v16 }
 0x5ec   : > { %1275 = vst [vmem:[%s2340_s8 + $0x30] sm:$0xff] %v1263_v15   ;;  %vm969_vm9 = vmand %vm441_vm0, %vm953_vm8 }
 0x5ed   : > { %v985_v57 = vsel %vm969_vm9, %v1833_v0, 0.0 }
 0x5ee   : > { %v1268_v58 = vpack.c.bf16 %v985_v57, %v984_v18 }
 0x5f0   : > { %1276 = vst [vmem:[%s2340_s8 + $0x38] sm:$0xff] %v1268_v58  }
 0x5f1   : > { %1489 = shalt.err (!%p1486_p7)
}
 0x5f2   : > { %s1490_s30 = scalar_lea.hbm %s2405_s11, 1024  ;;  %s1494_s10 = scalar_lea.hbm %s2455_s3, 2048 }
 0x5f3   : > { %p1491_p9 = scmp.ne.s32.totalorder %s2405_s11, %s1490_s30  ;;  %p1495_p5 = scmp.lt.u32.totalorder %s2405_s11, %s2455_s3 }
 0x5f4   : > { %p1496_p11 = scmp.lt.u32.totalorder %s1494_s10, %s1490_s30  ;;  %p1498_p4 = scmp.lt.u32.totalorder %s1490_s30, %s2405_s11 }
 0x5f5   : > { %p1492_p1 = pnand %p1491_p9, %p1669_p12 }
 0x5f6   : > { %p1497_p2 = por %p1496_p11, %p1495_p5 }
 0x5f7   : > { %p1493_p0 = pneg %p1492_p1 }
 0x5f8   : > { %p1499_p6 = por %p1498_p4, %p1497_p2 }
 0x5fa   : > { %p1500_p8 = pnand %p1499_p6, %p1493_p0 }
 0x5fc   : > { %1503 = shalt.err (!%p1500_p8)
}
 0x5fd   : > { %s1553_s20 = smov 64   ;;  %s1554_s8 = smov 4  }
 0x5fe   : > { %1347 = dma.vmem_to_hbm [thread:$0]  (%p1669_p12), %s2407_s9, 1024, %s2405_s11, %s1067_s16, %s1553_s20, %s1553_s20, %s1554_s8  }
 0x5ff PF: > { %s1095_s4 = sand.u32 1, %s1534_s12   ;;  %p2470_p10 = scmp.ne.s32.totalorder %s2460_s19, 0 }
 0x600   : > { %p2471_p13 = scmp.ge.s32.totalorder %s1546_s15, 2  ;;  %s1096_s25 = scalar_lea.sflag [#allocation4], %s1095_s4 }
 0x602   : > { %p1358_p3 = pnand %p2471_p13, %p2470_p10 }
 0x604   : > { %1529 = dma.done.wait (!%p1358_p3), %s1096_s25, 1024  }
 0x605   : > { %1531 = vsyncadd (!%p1358_p3), %s1096_s25, 4294966272  ;;  %p17_p7 = scmp.ge.s32.totalorder %s1631_s24, 4   ;;  %s2472_s12 = smov %s1538_s13 }
 0x606   : > { %s2473_s13 = smov %s1542_s14  ;;  %s2474_s14 = smov %s1665_s17 }
 0x607   : > { %s2475_s15 = smov %s1631_s24  ;;  %19 = sbr.rel (!%p17_p7) target bundleno = 6 (0x6), region = 81 }
 0x60e   :  { %1101 = vsyncpa [#allocation3], 1 }
 0x60f   :  { %1103 = vsyncpa [#allocation3 + $0x1], 1 }
 0x610   :  { %1104 = vsyncpa [#allocation6], 1 }
 0x611   :  { %1105 = vsyncpa [#allocation4], 1 }
 0x612   :  { %1107 = vsyncpa [#allocation4 + $0x1], 1 }

</bundles_post_ra>
